<compile_context>
chip_gen: v7x
topology: tpu7x:2x2x1
jax: 0.10.0
libtpu: 0.0.40
codegen_flags: <defaults>
</compile_context>

<pallas_src>
import math
import functools

import jax
import jax.numpy as jnp
from jax import lax
from jax.experimental import pallas as pl
from jax.experimental.pallas import tpu as pltpu


# ----------------------------------------------------------------------------- kernel


def _bert_xattn_kernel(x_ref, c_ref, m_ref,
                       wq_ref, bq_ref, wkv_ref, bkv_ref, wo_ref, bo_ref,
                       gamma_ref, beta_ref,
                       out_ref, *rest,
                       num_heads, head_dim, ln_eps,
                       compute_dtype, exp_dtype, return_scores, reuse_kv):
    nH, d = num_heads, head_dim
    H = nH * d

    if return_scores:
        scores_ref = rest[0]
        q_sc, ctx_sc, k_cache, v_cache = rest[1:]
    else:
        scores_ref = None
        q_sc, ctx_sc, k_cache, v_cache = rest

    qi = pl.program_id(1)

    x = x_ref[0].astype(jnp.float32)          # (tq, H) residual kept in f32
    x_c = x_ref[0].astype(compute_dtype)
    mask = m_ref[...].astype(jnp.float32)     # (1, 1, Sk) additive key mask

    # --- Fused K/V projection (wide: N = 2H). Cached across query tiles of a batch elem.
    def project_kv():
        c = c_ref[0].astype(compute_dtype)                                    # (Sk, H)
        kv = lax.dot_general(c, wkv_ref[...], (((1,), (0,)), ((), ())),
                             preferred_element_type=jnp.float32) + bkv_ref[...]
        for h in range(nH):                                # static unroll -> per-head layout
            k_cache[h] = kv[:, h * d:(h + 1) * d].astype(compute_dtype)
            v_cache[h] = kv[:, H + h * d:H + (h + 1) * d].astype(compute_dtype)

    if reuse_kv:
        pl.when(qi == 0)(project_kv)          # q-tile axis must then be "arbitrary"
    else:
        project_kv()                          # recompute per tile (fully parallel grid)

    # --- Q projection (wide: N = H); 1/sqrt(d) already folded into wq/bq.
    q = lax.dot_general(x_c, wq_ref[...], (((1,), (0,)), ((), ())),
                        preferred_element_type=jnp.float32) + bq_ref[...]     # (tq, H)
    for h in range(nH):
        q_sc[h] = q[:, h * d:(h + 1) * d].astype(compute_dtype)

    qb = q_sc[...]                            # (nH, tq, d)
    kb = k_cache[...]                         # (nH, Sk, d)
    vb = v_cache[...]                         # (nH, Sk, d)

    # --- Scores: batched over heads, contracting head_dim (f32 accumulation on MXU).
    s = jnp.einsum('hqd,hkd->hqk', qb, kb,
                   preferred_element_type=jnp.float32) + mask                 # (nH, tq, Sk)
    if scores_ref is not None:
        scores_ref[0] = s.astype(scores_ref.dtype)

    # --- Softmax with deferred normalization (normalize the small (nH,tq,d) context,
    #     not the (nH,tq,Sk) probability matrix).
    s_max = jnp.max(s, axis=-1, keepdims=True)
    e = jnp.exp((s - s_max).astype(exp_dtype))                    # bf16 EUP on v6e/v7x
    denom = jnp.sum(e, axis=-1, keepdims=True, dtype=jnp.float32)             # (nH, tq, 1)
    ctx = jnp.einsum('hqk,hkd->hqd', e.astype(compute_dtype), vb,
                     preferred_element_type=jnp.float32)                      # (nH, tq, d)
    ctx = ctx * (1.0 / denom)                 # exact reciprocal; only nH*tq elements

    # Merge heads back into a lane-dense (tq, H) slab for a full-width output dense.
    for h in range(nH):
        ctx_sc[:, h * d:(h + 1) * d] = ctx[h].astype(compute_dtype)

    # --- Output dense (K = H) + residual + LayerNorm (all f32).
    y = lax.dot_general(ctx_sc[...], wo_ref[...], (((1,), (0,)), ((), ())),
                        preferred_element_type=jnp.float32)
    y = y + bo_ref[...] + x
    mean = jnp.mean(y, axis=-1, keepdims=True)
    var = jnp.mean(jnp.square(y - mean), axis=-1, keepdims=True)
    y = (y - mean) * lax.rsqrt(var + ln_eps)
    y = y * gamma_ref[...] + beta_ref[...]
    out_ref[0] = y.astype(out_ref.dtype)


# ----------------------------------------------------------------------------- packing


def pack_bert_x_attention_params(params, *, num_heads, compute_dtype=jnp.bfloat16):
    """One-time weight packing (do NOT call per forward step).

    Folds 1/sqrt(d) into Q, fuses K/V into one (H, 2H) slab, transposes nn.Linear
    weights to (in, out) layout and casts matmul weights to compute_dtype.
    """
    H = params["wq"].shape[0]
    assert H % num_heads == 0
    d = H // num_heads
    scale = 1.0 / math.sqrt(d)
    f32 = jnp.float32
    return {
        "wq": (params["wq"].T * scale).astype(compute_dtype),                  # (H, H)
        "bq": (params["bq"] * scale).reshape(1, H).astype(f32),
        "wkv": jnp.concatenate([params["wk"].T, params["wv"].T], axis=1
                               ).astype(compute_dtype),                        # (H, 2H)
        "bkv": jnp.concatenate([params["bk"], params["bv"]]
                               ).reshape(1, 2 * H).astype(f32),
        "wo": params["wo"].T.astype(compute_dtype),                            # (H, H)
        "bo": params["bo"].reshape(1, H).astype(f32),
        "gamma": params["ln_gamma"].reshape(1, H).astype(f32),
        "beta": params["ln_beta"].reshape(1, H).astype(f32),
    }


# ----------------------------------------------------------------------------- wrapper


def bert_x_attention(input_tensor, ctx_tensor, ctx_att_mask, packed, *,
                     num_heads, ln_eps=1e-12,
                     compute_dtype=jnp.bfloat16, exp_dtype=None,
                     return_scores=True, scores_dtype=jnp.float32,
                     block_q=None, reuse_kv=True,
                     vmem_limit_bytes=64 * 1024 * 1024):
    """Forward of BertXAttention (eval mode). Returns (attention_output, attention_scores).

    `packed` must come from pack_bert_x_attention_params(..., compute_dtype=compute_dtype).
    attention_scores is None when return_scores=False.
    """
    B, Sq, H = input_tensor.shape
    Bc, Sk, Hc = ctx_tensor.shape
    assert Bc == B and Hc == H
    assert H % num_heads == 0
    d = H // num_heads

    if exp_dtype is None:
        exp_dtype = compute_dtype          # pass jnp.float32 here on v5e (no bf16 EUP)
    if block_q is None:
        block_q = Sq
        if Sq > 512:                       # bound per-step VMEM (v7x: 64 MiB)
            for cand in (512, 256, 128):
                if Sq % cand == 0:
                    block_q = cand
                    break
    assert Sq % block_q == 0, "block_q must divide Sq"
    n_q = Sq // block_q

    x_in = input_tensor.astype(jnp.float32)            # residual precision
    c_in = ctx_tensor.astype(compute_dtype)            # only feeds MXU -> compute dtype
    mask = jnp.asarray(ctx_att_mask).astype(jnp.float32).reshape(B, 1, Sk)

    kernel = functools.partial(
        _bert_xattn_kernel,
        num_heads=num_heads, head_dim=d, ln_eps=ln_eps,
        compute_dtype=compute_dtype, exp_dtype=exp_dtype,
        return_scores=return_scores, reuse_kv=reuse_kv)

    def resident(shape):                   # VMEM-resident: fetched once for the whole grid
        zeros = (0,) * len(shape)
        return pl.BlockSpec(shape, lambda b, qi: zeros)

    in_specs = [
        pl.BlockSpec((1, block_q, H), lambda b, qi: (b, qi, 0)),   # input_tensor (query/residual)
        pl.BlockSpec((1, Sk, H), lambda b, qi: (b, 0, 0)),         # ctx_tensor (fetched once per b)
        pl.BlockSpec((1, 1, Sk), lambda b, qi: (b, 0, 0)),         # additive key mask
        resident((H, H)), resident((1, H)),                        # wq, bq (scale folded in)
        resident((H, 2 * H)), resident((1, 2 * H)),                # fused wkv, bkv
        resident((H, H)), resident((1, H)),                        # wo, bo
        resident((1, H)), resident((1, H)),                        # LN gamma, beta
    ]

    out_specs = [pl.BlockSpec((1, block_q, H), lambda b, qi: (b, qi, 0))]
    out_shapes = [jax.ShapeDtypeStruct((B, Sq, H), input_tensor.dtype)]
    if return_scores:
        out_specs.append(pl.BlockSpec((1, num_heads, block_q, Sk),
                                      lambda b, qi: (b, 0, qi, 0)))
        out_shapes.append(jax.ShapeDtypeStruct((B, num_heads, Sq, Sk), scores_dtype))

    scratch_shapes = [
        pltpu.VMEM((num_heads, block_q, d), compute_dtype),   # per-head Q staging
        pltpu.VMEM((block_q, H), compute_dtype),              # merged context staging
        pltpu.VMEM((num_heads, Sk, d), compute_dtype),        # K cache (per batch elem)
        pltpu.VMEM((num_heads, Sk, d), compute_dtype),        # V cache
    ]

    grid_spec = pltpu.PrefetchScalarGridSpec(
        num_scalar_prefetch=0,
        grid=(B, n_q),
        in_specs=in_specs,
        out_specs=out_specs,
        scratch_shapes=scratch_shapes)

    # K/V cache reuse requires the q-tile axis to stay on one core ("arbitrary");
    # with reuse_kv=False both axes are safe to parallelize (v7x dual-TC, small B).
    dim_sem = ("parallel", "arbitrary") if reuse_kv else ("parallel", "parallel")

    outs = pl.pallas_call(
        kernel,
        out_shape=tuple(out_shapes),
        grid_spec=grid_spec,
        compiler_params=pltpu.CompilerParams(
            dimension_semantics=dim_sem,
            vmem_limit_bytes=vmem_limit_bytes),
    )(x_in, c_in, mask,
      packed["wq"], packed["bq"], packed["wkv"], packed["bkv"],
      packed["wo"], packed["bo"], packed["gamma"], packed["beta"])

    if return_scores:
        return outs[0], outs[1]
    return outs[0], None


# ----------------------------------------------------------------------------- reference


def _reference(input_tensor, ctx_tensor, mask, params, *, num_heads, ln_eps=1e-12):
    """Pure-JAX f32 reference replicating the PyTorch forward (eval mode)."""
    B, Sq, H = input_tensor.shape
    _, Sk, _ = ctx_tensor.shape
    d = H // num_heads
    lin = lambda x, w, b: x @ w.T + b
    q = lin(input_tensor, params["wq"], params["bq"]).reshape(B, Sq, num_heads, d).transpose(0, 2, 1, 3)
    k = lin(ctx_tensor, params["wk"], params["bk"]).reshape(B, Sk, num_heads, d).transpose(0, 2, 1, 3)
    v = lin(ctx_tensor, params["wv"], params["bv"]).reshape(B, Sk, num_heads, d).transpose(0, 2, 1, 3)
    scores = jnp.einsum("bhqd,bhkd->bhqk", q, k) / math.sqrt(d)
    scores = scores + mask[:, None, None, :]
    probs = jax.nn.softmax(scores, axis=-1)
    ctx = jnp.einsum("bhqk,bhkd->bhqd", probs, v).transpose(0, 2, 1, 3).reshape(B, Sq, H)
    y = lin(ctx, params["wo"], params["bo"]) + input_tensor
    mu = y.mean(-1, keepdims=True)
    var = ((y - mu) ** 2).mean(-1, keepdims=True)
    y = (y - mu) / jnp.sqrt(var + ln_eps) * params["ln_gamma"] + params["ln_beta"]
    return y, scores


# ----------------------------------------------------------------------------- test


if __name__ == "__main__":
    # NOTE: these shapes are far below (8,128) tile minimums; they validate correctness
    # only. Profile with Sq/Sk/H multiples of 128 and d >= 64 for meaningful numbers.
    B, Sq, Sk, H, num_heads = 2, 8, 16, 32, 4

    key = jax.random.PRNGKey(0)
    ks = jax.random.split(key, 12)
    init = lambda k, shape, s=0.02: (s * jax.random.normal(k, shape)).astype(jnp.float32)

    params = {
        "wq": init(ks[0], (H, H)), "bq": init(ks[1], (H,)),
        "wk": init(ks[2], (H, H)), "bk": init(ks[3], (H,)),
        "wv": init(ks[4], (H, H)), "bv": init(ks[5], (H,)),
        "wo": init(ks[6], (H, H)), "bo": init(ks[7], (H,)),
        "ln_gamma": jnp.ones((H,), jnp.float32),
        "ln_beta": jnp.zeros((H,), jnp.float32),
    }

    x = jax.random.normal(ks[8], (B, Sq, H), dtype=jnp.float32)
    ctx = jax.random.normal(ks[9], (B, Sk, H), dtype=jnp.float32)
    # Additive BERT-style mask: 0 for visible, -10000 for masked-out key positions.
    key_valid = jax.random.bernoulli(ks[10], 0.8, (B, Sk))
    mask = jnp.where(key_valid, 0.0, -10000.0).astype(jnp.float32)

    ref_out, ref_scores = _reference(x, ctx, mask, params, num_heads=num_heads)

    # Default path: bf16 MXU inputs, f32 accumulation; weights packed once (hoisted).
    packed_bf16 = pack_bert_x_attention_params(params, num_heads=num_heads,
                                               compute_dtype=jnp.bfloat16)
    out, scores = bert_x_attention(x, ctx, mask, packed_bf16, num_heads=num_heads)
    jax.block_until_ready((out, scores))
    assert jnp.allclose(out, ref_out, atol=2e-2, rtol=2e-2), "attention_output mismatch (bf16)"
    assert jnp.allclose(scores, ref_scores, atol=2e-2, rtol=2e-2), "attention_scores mismatch (bf16)"

    # Full-f32 path for a tight numerical check (exact exp/reciprocal).
    packed_f32 = pack_bert_x_attention_params(params, num_heads=num_heads,
                                              compute_dtype=jnp.float32)
    out32, scores32 = bert_x_attention(x, ctx, mask, packed_f32, num_heads=num_heads,
                                       compute_dtype=jnp.float32)
    jax.block_until_ready((out32, scores32))
    assert jnp.allclose(out32, ref_out, atol=1e-3, rtol=1e-3), "attention_output mismatch (f32)"
    assert jnp.allclose(scores32, ref_scores, atol=1e-3, rtol=1e-3), "attention_scores mismatch (f32)"

    # No-scores / recompute-KV variant (skips the scores HBM stream; fully parallel grid).
    out_ns, no_scores = bert_x_attention(x, ctx, mask, packed_bf16, num_heads=num_heads,
                                         return_scores=False, reuse_kv=False)
    jax.block_until_ready(out_ns)
    assert no_scores is None
    assert jnp.allclose(out_ns, ref_out, atol=2e-2, rtol=2e-2), "attention_output mismatch (no-scores)"

    print("KERNEL_OK")
</pallas_src>

<mosaic_0001>
module attributes {stable_mosaic.version = 11 : i64} {
  func.func @_bert_xattn_kernel(%arg0: i32, %arg1: i32, %arg2: memref<1x8x32xf32, #tpu.memory_space<vmem>>, %arg3: memref<1x16x32xbf16, #tpu.memory_space<vmem>>, %arg4: memref<1x1x16xf32, #tpu.memory_space<vmem>>, %arg5: memref<32x32xbf16, #tpu.memory_space<vmem>>, %arg6: memref<1x32xf32, #tpu.memory_space<vmem>>, %arg7: memref<32x64xbf16, #tpu.memory_space<vmem>>, %arg8: memref<1x64xf32, #tpu.memory_space<vmem>>, %arg9: memref<32x32xbf16, #tpu.memory_space<vmem>>, %arg10: memref<1x32xf32, #tpu.memory_space<vmem>>, %arg11: memref<1x32xf32, #tpu.memory_space<vmem>>, %arg12: memref<1x32xf32, #tpu.memory_space<vmem>>, %arg13: memref<1x8x32xf32, #tpu.memory_space<vmem>>, %arg14: memref<1x4x8x16xf32, #tpu.memory_space<vmem>>, %arg15: memref<4x8x8xbf16, #tpu.memory_space<vmem>>, %arg16: memref<8x32xbf16, #tpu.memory_space<vmem>>, %arg17: memref<4x16x8xbf16, #tpu.memory_space<vmem>>, %arg18: memref<4x16x8xbf16, #tpu.memory_space<vmem>>) attributes {dimension_semantics = [#tpu.dimension_semantics<parallel>, #tpu.dimension_semantics<arbitrary>], iteration_bounds = array<i64: 2, 1>, scalar_prefetch = 0 : i64, scratch_operands = 4 : i64, tpu.core_type = #tpu.core_type<tc>, window_params = [{transform_indices = @transform_0, window_bounds = array<i64: 1, 8, 32>}, {transform_indices = @transform_1, window_bounds = array<i64: 1, 16, 32>}, {transform_indices = @transform_2, window_bounds = array<i64: 1, 1, 16>}, {pipeline_mode = #tpu.pipeline_mode<synchronous>, transform_indices = @transform_3, window_bounds = array<i64: 32, 32>}, {pipeline_mode = #tpu.pipeline_mode<synchronous>, transform_indices = @transform_4, window_bounds = array<i64: 1, 32>}, {pipeline_mode = #tpu.pipeline_mode<synchronous>, transform_indices = @transform_5, window_bounds = array<i64: 32, 64>}, {pipeline_mode = #tpu.pipeline_mode<synchronous>, transform_indices = @transform_6, window_bounds = array<i64: 1, 64>}, {pipeline_mode = #tpu.pipeline_mode<synchronous>, transform_indices = @transform_7, window_bounds = array<i64: 32, 32>}, {pipeline_mode = #tpu.pipeline_mode<synchronous>, transform_indices = @transform_8, window_bounds = array<i64: 1, 32>}, {pipeline_mode = #tpu.pipeline_mode<synchronous>, transform_indices = @transform_9, window_bounds = array<i64: 1, 32>}, {pipeline_mode = #tpu.pipeline_mode<synchronous>, transform_indices = @transform_10, window_bounds = array<i64: 1, 32>}, {transform_indices = @transform_11, window_bounds = array<i64: 1, 8, 32>}, {transform_indices = @transform_12, window_bounds = array<i64: 1, 4, 8, 16>}]} {
    %c0 = arith.constant 0 : index
    %c0_0 = arith.constant 0 : index
    %c0_1 = arith.constant 0 : index
    %0 = vector.load %arg2[%c0, %c0_0, %c0_1] : memref<1x8x32xf32, #tpu.memory_space<vmem>>, vector<1x8x32xf32>
    %1 = vector.shape_cast %0 : vector<1x8x32xf32> to vector<8x32xf32>
    %c0_2 = arith.constant 0 : index
    %c0_3 = arith.constant 0 : index
    %c0_4 = arith.constant 0 : index
    %2 = vector.load %arg2[%c0_2, %c0_3, %c0_4] : memref<1x8x32xf32, #tpu.memory_space<vmem>>, vector<1x8x32xf32>
    %3 = vector.shape_cast %2 : vector<1x8x32xf32> to vector<8x32xf32>
    %4 = arith.truncf %3 : vector<8x32xf32> to vector<8x32xbf16>
    %c0_5 = arith.constant 0 : index
    %c0_6 = arith.constant 0 : index
    %c0_7 = arith.constant 0 : index
    %5 = vector.load %arg4[%c0_5, %c0_6, %c0_7] : memref<1x1x16xf32, #tpu.memory_space<vmem>>, vector<1x1x16xf32>
    %c0_i32 = arith.constant 0 : i32
    %6 = arith.cmpi eq, %arg1, %c0_i32 : i32
    %7 = arith.extui %6 : i1 to i32
    %c0_i32_8 = arith.constant 0 : i32
    %8 = arith.cmpi ne, %7, %c0_i32_8 : i32
    scf.if %8 {
      %c0_64 = arith.constant 0 : index
      %c0_65 = arith.constant 0 : index
      %c0_66 = arith.constant 0 : index
      %107 = vector.load %arg3[%c0_64, %c0_65, %c0_66] : memref<1x16x32xbf16, #tpu.memory_space<vmem>>, vector<1x16x32xbf16>
      %108 = vector.shape_cast %107 : vector<1x16x32xbf16> to vector<16x32xbf16>
      %c0_67 = arith.constant 0 : index
      %c0_68 = arith.constant 0 : index
      %109 = vector.load %arg7[%c0_67, %c0_68] : memref<32x64xbf16, #tpu.memory_space<vmem>>, vector<32x64xbf16>
      %cst_69 = arith.constant dense<0.000000e+00> : vector<16x64xf32>
      %110 = tpu.matmul %108, %109, %cst_69 {dimension_numbers = #tpu.dot_dimension_numbers<[1], [0], [0], [1], [0, 0, 1, 1], [], []>} : vector<16x32xbf16>, vector<32x64xbf16>, vector<16x64xf32> -> vector<16x64xf32>
      %c0_70 = arith.constant 0 : index
      %c0_71 = arith.constant 0 : index
      %111 = vector.load %arg8[%c0_70, %c0_71] : memref<1x64xf32, #tpu.memory_space<vmem>>, vector<1x64xf32>
      %112 = vector.broadcast %111 : vector<1x64xf32> to vector<16x64xf32>
      %113 = arith.addf %110, %112 : vector<16x64xf32>
      %114 = vector.extract_strided_slice %113 {offsets = [0, 0], sizes = [16, 8], strides = [1, 1]} : vector<16x64xf32> to vector<16x8xf32>
      %115 = arith.truncf %114 : vector<16x8xf32> to vector<16x8xbf16>
      %c0_72 = arith.constant 0 : index
      %c0_73 = arith.constant 0 : index
      %c0_74 = arith.constant 0 : index
      %116 = vector.load %arg17[%c0_72, %c0_73, %c0_74] : memref<4x16x8xbf16, #tpu.memory_space<vmem>>, vector<1x16x8xbf16>
      %117 = vector.shape_cast %116 : vector<1x16x8xbf16> to vector<16x8xbf16>
      %118 = vector.shape_cast %115 : vector<16x8xbf16> to vector<1x16x8xbf16>
      tpu.vector_store %arg17[%c0_72, %c0_73, %c0_74], %118 {strides = array<i32>} : memref<4x16x8xbf16, #tpu.memory_space<vmem>>, vector<1x16x8xbf16>,
      %119 = vector.extract_strided_slice %113 {offsets = [0, 32], sizes = [16, 8], strides = [1, 1]} : vector<16x64xf32> to vector<16x8xf32>
      %120 = arith.truncf %119 : vector<16x8xf32> to vector<16x8xbf16>
      %c0_75 = arith.constant 0 : index
      %c0_76 = arith.constant 0 : index
      %c0_77 = arith.constant 0 : index
      %121 = vector.load %arg18[%c0_75, %c0_76, %c0_77] : memref<4x16x8xbf16, #tpu.memory_space<vmem>>, vector<1x16x8xbf16>
      %122 = vector.shape_cast %121 : vector<1x16x8xbf16> to vector<16x8xbf16>
      %123 = vector.shape_cast %120 : vector<16x8xbf16> to vector<1x16x8xbf16>
      tpu.vector_store %arg18[%c0_75, %c0_76, %c0_77], %123 {strides = array<i32>} : memref<4x16x8xbf16, #tpu.memory_space<vmem>>, vector<1x16x8xbf16>,
      %124 = vector.extract_strided_slice %113 {offsets = [0, 8], sizes = [16, 8], strides = [1, 1]} : vector<16x64xf32> to vector<16x8xf32>
      %125 = arith.truncf %124 : vector<16x8xf32> to vector<16x8xbf16>
      %c1_78 = arith.constant 1 : index
      %c0_79 = arith.constant 0 : index
      %c0_80 = arith.constant 0 : index
      %126 = vector.load %arg17[%c1_78, %c0_79, %c0_80] : memref<4x16x8xbf16, #tpu.memory_space<vmem>>, vector<1x16x8xbf16>
      %127 = vector.shape_cast %126 : vector<1x16x8xbf16> to vector<16x8xbf16>
      %128 = vector.shape_cast %125 : vector<16x8xbf16> to vector<1x16x8xbf16>
      tpu.vector_store %arg17[%c1_78, %c0_79, %c0_80], %128 {strides = array<i32>} : memref<4x16x8xbf16, #tpu.memory_space<vmem>>, vector<1x16x8xbf16>,
      %129 = vector.extract_strided_slice %113 {offsets = [0, 40], sizes = [16, 8], strides = [1, 1]} : vector<16x64xf32> to vector<16x8xf32>
      %130 = arith.truncf %129 : vector<16x8xf32> to vector<16x8xbf16>
      %c1_81 = arith.constant 1 : index
      %c0_82 = arith.constant 0 : index
      %c0_83 = arith.constant 0 : index
      %131 = vector.load %arg18[%c1_81, %c0_82, %c0_83] : memref<4x16x8xbf16, #tpu.memory_space<vmem>>, vector<1x16x8xbf16>
      %132 = vector.shape_cast %131 : vector<1x16x8xbf16> to vector<16x8xbf16>
      %133 = vector.shape_cast %130 : vector<16x8xbf16> to vector<1x16x8xbf16>
      tpu.vector_store %arg18[%c1_81, %c0_82, %c0_83], %133 {strides = array<i32>} : memref<4x16x8xbf16, #tpu.memory_space<vmem>>, vector<1x16x8xbf16>,
      %134 = vector.extract_strided_slice %113 {offsets = [0, 16], sizes = [16, 8], strides = [1, 1]} : vector<16x64xf32> to vector<16x8xf32>
      %135 = arith.truncf %134 : vector<16x8xf32> to vector<16x8xbf16>
      %c2_84 = arith.constant 2 : index
      %c0_85 = arith.constant 0 : index
      %c0_86 = arith.constant 0 : index
      %136 = vector.load %arg17[%c2_84, %c0_85, %c0_86] : memref<4x16x8xbf16, #tpu.memory_space<vmem>>, vector<1x16x8xbf16>
      %137 = vector.shape_cast %136 : vector<1x16x8xbf16> to vector<16x8xbf16>
      %138 = vector.shape_cast %135 : vector<16x8xbf16> to vector<1x16x8xbf16>
      tpu.vector_store %arg17[%c2_84, %c0_85, %c0_86], %138 {strides = array<i32>} : memref<4x16x8xbf16, #tpu.memory_space<vmem>>, vector<1x16x8xbf16>,
      %139 = vector.extract_strided_slice %113 {offsets = [0, 48], sizes = [16, 8], strides = [1, 1]} : vector<16x64xf32> to vector<16x8xf32>
      %140 = arith.truncf %139 : vector<16x8xf32> to vector<16x8xbf16>
      %c2_87 = arith.constant 2 : index
      %c0_88 = arith.constant 0 : index
      %c0_89 = arith.constant 0 : index
      %141 = vector.load %arg18[%c2_87, %c0_88, %c0_89] : memref<4x16x8xbf16, #tpu.memory_space<vmem>>, vector<1x16x8xbf16>
      %142 = vector.shape_cast %141 : vector<1x16x8xbf16> to vector<16x8xbf16>
      %143 = vector.shape_cast %140 : vector<16x8xbf16> to vector<1x16x8xbf16>
      tpu.vector_store %arg18[%c2_87, %c0_88, %c0_89], %143 {strides = array<i32>} : memref<4x16x8xbf16, #tpu.memory_space<vmem>>, vector<1x16x8xbf16>,
      %144 = vector.extract_strided_slice %113 {offsets = [0, 24], sizes = [16, 8], strides = [1, 1]} : vector<16x64xf32> to vector<16x8xf32>
      %145 = arith.truncf %144 : vector<16x8xf32> to vector<16x8xbf16>
      %c3_90 = arith.constant 3 : index
      %c0_91 = arith.constant 0 : index
      %c0_92 = arith.constant 0 : index
      %146 = vector.load %arg17[%c3_90, %c0_91, %c0_92] : memref<4x16x8xbf16, #tpu.memory_space<vmem>>, vector<1x16x8xbf16>
      %147 = vector.shape_cast %146 : vector<1x16x8xbf16> to vector<16x8xbf16>
      %148 = vector.shape_cast %145 : vector<16x8xbf16> to vector<1x16x8xbf16>
      tpu.vector_store %arg17[%c3_90, %c0_91, %c0_92], %148 {strides = array<i32>} : memref<4x16x8xbf16, #tpu.memory_space<vmem>>, vector<1x16x8xbf16>,
      %149 = vector.extract_strided_slice %113 {offsets = [0, 56], sizes = [16, 8], strides = [1, 1]} : vector<16x64xf32> to vector<16x8xf32>
      %150 = arith.truncf %149 : vector<16x8xf32> to vector<16x8xbf16>
      %c3_93 = arith.constant 3 : index
      %c0_94 = arith.constant 0 : index
      %c0_95 = arith.constant 0 : index
      %151 = vector.load %arg18[%c3_93, %c0_94, %c0_95] : memref<4x16x8xbf16, #tpu.memory_space<vmem>>, vector<1x16x8xbf16>
      %152 = vector.shape_cast %151 : vector<1x16x8xbf16> to vector<16x8xbf16>
      %153 = vector.shape_cast %150 : vector<16x8xbf16> to vector<1x16x8xbf16>
      tpu.vector_store %arg18[%c3_93, %c0_94, %c0_95], %153 {strides = array<i32>} : memref<4x16x8xbf16, #tpu.memory_space<vmem>>, vector<1x16x8xbf16>,
    } else {
    }
    %c0_9 = arith.constant 0 : index
    %c0_10 = arith.constant 0 : index
    %9 = vector.load %arg5[%c0_9, %c0_10] : memref<32x32xbf16, #tpu.memory_space<vmem>>, vector<32x32xbf16>
    %cst = arith.constant dense<0.000000e+00> : vector<8x32xf32>
    %10 = tpu.matmul %4, %9, %cst {dimension_numbers = #tpu.dot_dimension_numbers<[1], [0], [0], [1], [0, 0, 1, 1], [], []>} : vector<8x32xbf16>, vector<32x32xbf16>, vector<8x32xf32> -> vector<8x32xf32>
    %c0_11 = arith.constant 0 : index
    %c0_12 = arith.constant 0 : index
    %11 = vector.load %arg6[%c0_11, %c0_12] : memref<1x32xf32, #tpu.memory_space<vmem>>, vector<1x32xf32>
    %12 = vector.broadcast %11 : vector<1x32xf32> to vector<8x32xf32>
    %13 = arith.addf %10, %12 : vector<8x32xf32>
    %14 = vector.extract_strided_slice %13 {offsets = [0, 0], sizes = [8, 8], strides = [1, 1]} : vector<8x32xf32> to vector<8x8xf32>
    %15 = arith.truncf %14 : vector<8x8xf32> to vector<8x8xbf16>
    %c0_13 = arith.constant 0 : index
    %c0_14 = arith.constant 0 : index
    %c0_15 = arith.constant 0 : index
    %16 = vector.load %arg15[%c0_13, %c0_14, %c0_15] : memref<4x8x8xbf16, #tpu.memory_space<vmem>>, vector<1x8x8xbf16>
    %17 = vector.shape_cast %16 : vector<1x8x8xbf16> to vector<8x8xbf16>
    %18 = vector.shape_cast %15 : vector<8x8xbf16> to vector<1x8x8xbf16>
    tpu.vector_store %arg15[%c0_13, %c0_14, %c0_15], %18 {strides = array<i32>} : memref<4x8x8xbf16, #tpu.memory_space<vmem>>, vector<1x8x8xbf16>,
    %19 = vector.extract_strided_slice %13 {offsets = [0, 8], sizes = [8, 8], strides = [1, 1]} : vector<8x32xf32> to vector<8x8xf32>
    %20 = arith.truncf %19 : vector<8x8xf32> to vector<8x8xbf16>
    %c1 = arith.constant 1 : index
    %c0_16 = arith.constant 0 : index
    %c0_17 = arith.constant 0 : index
    %21 = vector.load %arg15[%c1, %c0_16, %c0_17] : memref<4x8x8xbf16, #tpu.memory_space<vmem>>, vector<1x8x8xbf16>
    %22 = vector.shape_cast %21 : vector<1x8x8xbf16> to vector<8x8xbf16>
    %23 = vector.shape_cast %20 : vector<8x8xbf16> to vector<1x8x8xbf16>
    tpu.vector_store %arg15[%c1, %c0_16, %c0_17], %23 {strides = array<i32>} : memref<4x8x8xbf16, #tpu.memory_space<vmem>>, vector<1x8x8xbf16>,
    %24 = vector.extract_strided_slice %13 {offsets = [0, 16], sizes = [8, 8], strides = [1, 1]} : vector<8x32xf32> to vector<8x8xf32>
    %25 = arith.truncf %24 : vector<8x8xf32> to vector<8x8xbf16>
    %c2 = arith.constant 2 : index
    %c0_18 = arith.constant 0 : index
    %c0_19 = arith.constant 0 : index
    %26 = vector.load %arg15[%c2, %c0_18, %c0_19] : memref<4x8x8xbf16, #tpu.memory_space<vmem>>, vector<1x8x8xbf16>
    %27 = vector.shape_cast %26 : vector<1x8x8xbf16> to vector<8x8xbf16>
    %28 = vector.shape_cast %25 : vector<8x8xbf16> to vector<1x8x8xbf16>
    tpu.vector_store %arg15[%c2, %c0_18, %c0_19], %28 {strides = array<i32>} : memref<4x8x8xbf16, #tpu.memory_space<vmem>>, vector<1x8x8xbf16>,
    %29 = vector.extract_strided_slice %13 {offsets = [0, 24], sizes = [8, 8], strides = [1, 1]} : vector<8x32xf32> to vector<8x8xf32>
    %30 = arith.truncf %29 : vector<8x8xf32> to vector<8x8xbf16>
    %c3 = arith.constant 3 : index
    %c0_20 = arith.constant 0 : index
    %c0_21 = arith.constant 0 : index
    %31 = vector.load %arg15[%c3, %c0_20, %c0_21] : memref<4x8x8xbf16, #tpu.memory_space<vmem>>, vector<1x8x8xbf16>
    %32 = vector.shape_cast %31 : vector<1x8x8xbf16> to vector<8x8xbf16>
    %33 = vector.shape_cast %30 : vector<8x8xbf16> to vector<1x8x8xbf16>
    tpu.vector_store %arg15[%c3, %c0_20, %c0_21], %33 {strides = array<i32>} : memref<4x8x8xbf16, #tpu.memory_space<vmem>>, vector<1x8x8xbf16>,
    %c0_22 = arith.constant 0 : index
    %c0_23 = arith.constant 0 : index
    %c0_24 = arith.constant 0 : index
    %34 = vector.load %arg15[%c0_22, %c0_23, %c0_24] : memref<4x8x8xbf16, #tpu.memory_space<vmem>>, vector<4x8x8xbf16>
    %c0_25 = arith.constant 0 : index
    %c0_26 = arith.constant 0 : index
    %c0_27 = arith.constant 0 : index
    %35 = vector.load %arg17[%c0_25, %c0_26, %c0_27] : memref<4x16x8xbf16, #tpu.memory_space<vmem>>, vector<4x16x8xbf16>
    %c0_28 = arith.constant 0 : index
    %c0_29 = arith.constant 0 : index
    %c0_30 = arith.constant 0 : index
    %36 = vector.load %arg18[%c0_28, %c0_29, %c0_30] : memref<4x16x8xbf16, #tpu.memory_space<vmem>>, vector<4x16x8xbf16>
    "tpu.trace_start"() <{level = 10 : i32, message = "hqd,hkd->hqk"}> : () -> ()
    %cst_31 = arith.constant dense<0.000000e+00> : vector<4x8x16xf32>
    %37 = tpu.matmul %34, %35, %cst_31 {dimension_numbers = #tpu.dot_dimension_numbers<[2], [2], [1], [1], [0, 0, 0, 1, 1, 1], [0], [0]>} : vector<4x8x8xbf16>, vector<4x16x8xbf16>, vector<4x8x16xf32> -> vector<4x8x16xf32>
    "tpu.trace_stop"() : () -> ()
    %38 = vector.broadcast %5 : vector<1x1x16xf32> to vector<4x8x16xf32>
    %39 = arith.addf %37, %38 : vector<4x8x16xf32>
    %c0_32 = arith.constant 0 : index
    %c0_33 = arith.constant 0 : index
    %c0_34 = arith.constant 0 : index
    %c0_35 = arith.constant 0 : index
    %40 = vector.load %arg14[%c0_32, %c0_33, %c0_34, %c0_35] : memref<1x4x8x16xf32, #tpu.memory_space<vmem>>, vector<1x4x8x16xf32>
    %41 = vector.shape_cast %40 : vector<1x4x8x16xf32> to vector<4x8x16xf32>
    %42 = vector.shape_cast %39 : vector<4x8x16xf32> to vector<1x4x8x16xf32>
    tpu.vector_store %arg14[%c0_32, %c0_33, %c0_34, %c0_35], %42 {strides = array<i32>} : memref<1x4x8x16xf32, #tpu.memory_space<vmem>>, vector<1x4x8x16xf32>,
    %cst_36 = arith.constant dense<0xFF800000> : vector<4x8xf32>
    %43 = vector.multi_reduction <maximumf>, %39, %cst_36 [2] : vector<4x8x16xf32> to vector<4x8xf32>
    %44 = vector.shape_cast %43 : vector<4x8xf32> to vector<4x8x1xf32>
    %45 = vector.broadcast %44 : vector<4x8x1xf32> to vector<4x8x16xf32>
    %46 = arith.subf %39, %45 : vector<4x8x16xf32>
    %47 = arith.truncf %46 : vector<4x8x16xf32> to vector<4x8x16xbf16>
    %48 = math.exp %47 : vector<4x8x16xbf16>
    %49 = arith.extf %48 : vector<4x8x16xbf16> to vector<4x8x16xf32>
    %cst_37 = arith.constant dense<0.000000e+00> : vector<4x8xf32>
    %50 = vector.multi_reduction <add>, %49, %cst_37 [2] : vector<4x8x16xf32> to vector<4x8xf32>
    %51 = vector.shape_cast %50 : vector<4x8xf32> to vector<4x8x1xf32>
    "tpu.trace_start"() <{level = 10 : i32, message = "hqk,hkd->hqd"}> : () -> ()
    %cst_38 = arith.constant dense<0.000000e+00> : vector<4x8x8xf32>
    %52 = tpu.matmul %48, %36, %cst_38 {dimension_numbers = #tpu.dot_dimension_numbers<[2], [1], [1], [2], [0, 0, 0, 1, 1, 2], [0], [0]>} : vector<4x8x16xbf16>, vector<4x16x8xbf16>, vector<4x8x8xf32> -> vector<4x8x8xf32>
    "tpu.trace_stop"() : () -> ()
    %cst_39 = arith.constant 1.000000e+00 : f32
    %53 = vector.broadcast %cst_39 : f32 to vector<4x8x1xf32>
    %54 = arith.divf %53, %51 : vector<4x8x1xf32>
    %55 = vector.broadcast %54 : vector<4x8x1xf32> to vector<4x8x8xf32>
    %56 = arith.mulf %52, %55 : vector<4x8x8xf32>
    %57 = vector.extract_strided_slice %56 {offsets = [0, 0, 0], sizes = [1, 8, 8], strides = [1, 1, 1]} : vector<4x8x8xf32> to vector<1x8x8xf32>
    %58 = vector.shape_cast %57 : vector<1x8x8xf32> to vector<8x8xf32>
    %59 = arith.truncf %58 : vector<8x8xf32> to vector<8x8xbf16>
    %c0_40 = arith.constant 0 : index
    %c0_41 = arith.constant 0 : index
    %60 = vector.load %arg16[%c0_40, %c0_41] : memref<8x32xbf16, #tpu.memory_space<vmem>>, vector<8x8xbf16>
    tpu.vector_store %arg16[%c0_40, %c0_41], %59 {strides = array<i32>} : memref<8x32xbf16, #tpu.memory_space<vmem>>, vector<8x8xbf16>,
    %61 = vector.extract_strided_slice %56 {offsets = [1, 0, 0], sizes = [1, 8, 8], strides = [1, 1, 1]} : vector<4x8x8xf32> to vector<1x8x8xf32>
    %62 = vector.shape_cast %61 : vector<1x8x8xf32> to vector<8x8xf32>
    %63 = arith.truncf %62 : vector<8x8xf32> to vector<8x8xbf16>
    %c0_42 = arith.constant 0 : index
    %c8 = arith.constant 8 : index
    %64 = vector.load %arg16[%c0_42, %c8] : memref<8x32xbf16, #tpu.memory_space<vmem>>, vector<8x8xbf16>
    tpu.vector_store %arg16[%c0_42, %c8], %63 {strides = array<i32>} : memref<8x32xbf16, #tpu.memory_space<vmem>>, vector<8x8xbf16>,
    %65 = vector.extract_strided_slice %56 {offsets = [2, 0, 0], sizes = [1, 8, 8], strides = [1, 1, 1]} : vector<4x8x8xf32> to vector<1x8x8xf32>
    %66 = vector.shape_cast %65 : vector<1x8x8xf32> to vector<8x8xf32>
    %67 = arith.truncf %66 : vector<8x8xf32> to vector<8x8xbf16>
    %c0_43 = arith.constant 0 : index
    %c16 = arith.constant 16 : index
    %68 = vector.load %arg16[%c0_43, %c16] : memref<8x32xbf16, #tpu.memory_space<vmem>>, vector<8x8xbf16>
    tpu.vector_store %arg16[%c0_43, %c16], %67 {strides = array<i32>} : memref<8x32xbf16, #tpu.memory_space<vmem>>, vector<8x8xbf16>,
    %69 = vector.extract_strided_slice %56 {offsets = [3, 0, 0], sizes = [1, 8, 8], strides = [1, 1, 1]} : vector<4x8x8xf32> to vector<1x8x8xf32>
    %70 = vector.shape_cast %69 : vector<1x8x8xf32> to vector<8x8xf32>
    %71 = arith.truncf %70 : vector<8x8xf32> to vector<8x8xbf16>
    %c0_44 = arith.constant 0 : index
    %c24 = arith.constant 24 : index
    %72 = vector.load %arg16[%c0_44, %c24] : memref<8x32xbf16, #tpu.memory_space<vmem>>, vector<8x8xbf16>
    tpu.vector_store %arg16[%c0_44, %c24], %71 {strides = array<i32>} : memref<8x32xbf16, #tpu.memory_space<vmem>>, vector<8x8xbf16>,
    %c0_45 = arith.constant 0 : index
    %c0_46 = arith.constant 0 : index
    %73 = vector.load %arg16[%c0_45, %c0_46] : memref<8x32xbf16, #tpu.memory_space<vmem>>, vector<8x32xbf16>
    %c0_47 = arith.constant 0 : index
    %c0_48 = arith.constant 0 : index
    %74 = vector.load %arg9[%c0_47, %c0_48] : memref<32x32xbf16, #tpu.memory_space<vmem>>, vector<32x32xbf16>
    %cst_49 = arith.constant dense<0.000000e+00> : vector<8x32xf32>
    %75 = tpu.matmul %73, %74, %cst_49 {dimension_numbers = #tpu.dot_dimension_numbers<[1], [0], [0], [1], [0, 0, 1, 1], [], []>} : vector<8x32xbf16>, vector<32x32xbf16>, vector<8x32xf32> -> vector<8x32xf32>
    %c0_50 = arith.constant 0 : index
    %c0_51 = arith.constant 0 : index
    %76 = vector.load %arg10[%c0_50, %c0_51] : memref<1x32xf32, #tpu.memory_space<vmem>>, vector<1x32xf32>
    %77 = vector.broadcast %76 : vector<1x32xf32> to vector<8x32xf32>
    %78 = arith.addf %75, %77 : vector<8x32xf32>
    %79 = arith.addf %78, %1 : vector<8x32xf32>
    %cst_52 = arith.constant dense<0.000000e+00> : vector<8xf32>
    %80 = vector.multi_reduction <add>, %79, %cst_52 [1] : vector<8x32xf32> to vector<8xf32>
    %81 = vector.shape_cast %80 : vector<8xf32> to vector<8x1xf32>
    %cst_53 = arith.constant 3.200000e+01 : f32
    %82 = vector.broadcast %cst_53 : f32 to vector<8x1xf32>
    %83 = arith.divf %81, %82 : vector<8x1xf32>
    %84 = vector.broadcast %83 : vector<8x1xf32> to vector<8x32xf32>
    %85 = arith.subf %79, %84 : vector<8x32xf32>
    %86 = arith.mulf %85, %85 : vector<8x32xf32>
    %cst_54 = arith.constant dense<0.000000e+00> : vector<8xf32>
    %87 = vector.multi_reduction <add>, %86, %cst_54 [1] : vector<8x32xf32> to vector<8xf32>
    %88 = vector.shape_cast %87 : vector<8xf32> to vector<8x1xf32>
    %cst_55 = arith.constant 3.200000e+01 : f32
    %89 = vector.broadcast %cst_55 : f32 to vector<8x1xf32>
    %90 = arith.divf %88, %89 : vector<8x1xf32>
    %91 = vector.broadcast %83 : vector<8x1xf32> to vector<8x32xf32>
    %92 = arith.subf %79, %91 : vector<8x32xf32>
    %cst_56 = arith.constant 9.99999996E-13 : f32
    %93 = vector.broadcast %cst_56 : f32 to vector<8x1xf32>
    %94 = arith.addf %90, %93 : vector<8x1xf32>
    %95 = math.rsqrt %94 : vector<8x1xf32>
    %96 = vector.broadcast %95 : vector<8x1xf32> to vector<8x32xf32>
    %97 = arith.mulf %92, %96 : vector<8x32xf32>
    %c0_57 = arith.constant 0 : index
    %c0_58 = arith.constant 0 : index
    %98 = vector.load %arg11[%c0_57, %c0_58] : memref<1x32xf32, #tpu.memory_space<vmem>>, vector<1x32xf32>
    %99 = vector.broadcast %98 : vector<1x32xf32> to vector<8x32xf32>
    %100 = arith.mulf %97, %99 : vector<8x32xf32>
    %c0_59 = arith.constant 0 : index
    %c0_60 = arith.constant 0 : index
    %101 = vector.load %arg12[%c0_59, %c0_60] : memref<1x32xf32, #tpu.memory_space<vmem>>, vector<1x32xf32>
    %102 = vector.broadcast %101 : vector<1x32xf32> to vector<8x32xf32>
    %103 = arith.addf %100, %102 : vector<8x32xf32>
    %c0_61 = arith.constant 0 : index
    %c0_62 = arith.constant 0 : index
    %c0_63 = arith.constant 0 : index
    %104 = vector.load %arg13[%c0_61, %c0_62, %c0_63] : memref<1x8x32xf32, #tpu.memory_space<vmem>>, vector<1x8x32xf32>
    %105 = vector.shape_cast %104 : vector<1x8x32xf32> to vector<8x32xf32>
    %106 = vector.shape_cast %103 : vector<8x32xf32> to vector<1x8x32xf32>
    tpu.vector_store %arg13[%c0_61, %c0_62, %c0_63], %106 {strides = array<i32>} : memref<1x8x32xf32, #tpu.memory_space<vmem>>, vector<1x8x32xf32>,
    return
  }
  func.func @transform_0(%arg0: i32, %arg1: i32) -> (i32, i32, i32) {
    %c0_i32 = arith.constant 0 : i32
    %c0_i32_0 = arith.constant 0 : i32
    return %arg0, %arg1, %c0_i32 : i32, i32, i32
  }
  func.func @transform_1(%arg0: i32, %arg1: i32) -> (i32, i32, i32) {
    %c0_i32 = arith.constant 0 : i32
    %c0_i32_0 = arith.constant 0 : i32
    %c0_i32_1 = arith.constant 0 : i32
    return %arg0, %c0_i32, %c0_i32_0 : i32, i32, i32
  }
  func.func @transform_2(%arg0: i32, %arg1: i32) -> (i32, i32, i32) {
    %c0_i32 = arith.constant 0 : i32
    %c0_i32_0 = arith.constant 0 : i32
    %c0_i32_1 = arith.constant 0 : i32
    return %arg0, %c0_i32, %c0_i32_0 : i32, i32, i32
  }
  func.func @transform_3(%arg0: i32, %arg1: i32) -> (i32, i32) {
    %c0_i32 = arith.constant 0 : i32
    %c0_i32_0 = arith.constant 0 : i32
    %c0_i32_1 = arith.constant 0 : i32
    return %c0_i32, %c0_i32_0 : i32, i32
  }
  func.func @transform_4(%arg0: i32, %arg1: i32) -> (i32, i32) {
    %c0_i32 = arith.constant 0 : i32
    %c0_i32_0 = arith.constant 0 : i32
    %c0_i32_1 = arith.constant 0 : i32
    return %c0_i32, %c0_i32_0 : i32, i32
  }
  func.func @transform_5(%arg0: i32, %arg1: i32) -> (i32, i32) {
    %c0_i32 = arith.constant 0 : i32
    %c0_i32_0 = arith.constant 0 : i32
    %c0_i32_1 = arith.constant 0 : i32
    return %c0_i32, %c0_i32_0 : i32, i32
  }
  func.func @transform_6(%arg0: i32, %arg1: i32) -> (i32, i32) {
    %c0_i32 = arith.constant 0 : i32
    %c0_i32_0 = arith.constant 0 : i32
    %c0_i32_1 = arith.constant 0 : i32
    return %c0_i32, %c0_i32_0 : i32, i32
  }
  func.func @transform_7(%arg0: i32, %arg1: i32) -> (i32, i32) {
    %c0_i32 = arith.constant 0 : i32
    %c0_i32_0 = arith.constant 0 : i32
    %c0_i32_1 = arith.constant 0 : i32
    return %c0_i32, %c0_i32_0 : i32, i32
  }
  func.func @transform_8(%arg0: i32, %arg1: i32) -> (i32, i32) {
    %c0_i32 = arith.constant 0 : i32
    %c0_i32_0 = arith.constant 0 : i32
    %c0_i32_1 = arith.constant 0 : i32
    return %c0_i32, %c0_i32_0 : i32, i32
  }
  func.func @transform_9(%arg0: i32, %arg1: i32) -> (i32, i32) {
    %c0_i32 = arith.constant 0 : i32
    %c0_i32_0 = arith.constant 0 : i32
    %c0_i32_1 = arith.constant 0 : i32
    return %c0_i32, %c0_i32_0 : i32, i32
  }
  func.func @transform_10(%arg0: i32, %arg1: i32) -> (i32, i32) {
    %c0_i32 = arith.constant 0 : i32
    %c0_i32_0 = arith.constant 0 : i32
    %c0_i32_1 = arith.constant 0 : i32
    return %c0_i32, %c0_i32_0 : i32, i32
  }
  func.func @transform_11(%arg0: i32, %arg1: i32) -> (i32, i32, i32) {
    %c0_i32 = arith.constant 0 : i32
    %c0_i32_0 = arith.constant 0 : i32
    return %arg0, %arg1, %c0_i32 : i32, i32, i32
  }
  func.func @transform_12(%arg0: i32, %arg1: i32) -> (i32, i32, i32, i32) {
    %c0_i32 = arith.constant 0 : i32
    %c0_i32_0 = arith.constant 0 : i32
    %c0_i32_1 = arith.constant 0 : i32
    return %arg0, %c0_i32, %arg1, %c0_i32_0 : i32, i32, i32, i32
  }
}

</mosaic_0001>

<bundles_post_ra>
// kernel: tpu_custom_call.1
= control target key start
LH: loop header
LB: loop body
LE: loop exit
PB: predicated region body
PF: predicated region fallthrough
CT: control target
= control target key end

     0   :  { %s3197_s0 = inlined_call_operand.hbm [shape: f32[2,8,32], index: 0, kind: input, shape index: {}]   ;;  %s3198_s1 = inlined_call_operand.hbm [shape: bf16[2,16,32], index: 1, kind: input, shape index: {}]   ;;  %s3199_s2 = inlined_call_operand.hbm [shape: f32[2,1,16], index: 2, kind: input, shape index: {}]   ;;  %s3200_s3 = inlined_call_operand.hbm [shape: bf16[32,32], index: 3, kind: input, shape index: {}]   ;;  %s3201_s4 = inlined_call_operand.hbm [shape: f32[1,32], index: 4, kind: input, shape index: {}]   ;;  %s3202_s5 = inlined_call_operand.hbm [shape: bf16[32,64], index: 5, kind: input, shape index: {}]   ;;  %s3203_s6 = inlined_call_operand.hbm [shape: f32[1,64], index: 6, kind: input, shape index: {}]   ;;  %s3204_s7 = inlined_call_operand.hbm [shape: bf16[32,32], index: 7, kind: input, shape index: {}]   ;;  %s3205_s8 = inlined_call_operand.hbm [shape: f32[1,32], index: 8, kind: input, shape index: {}]   ;;  %s3206_s9 = inlined_call_operand.hbm [shape: f32[1,32], index: 9, kind: input, shape index: {}]   ;;  %s3207_s10 = inlined_call_operand.hbm [shape: f32[1,32], index: 10, kind: input, shape index: {}]   ;;  %s3208_s11 = inlined_call_operand.hbm [shape: f32[2,8,32], index: 11, kind: output, shape index: {0}]   ;;  %s3209_s12 = inlined_call_operand.hbm [shape: f32[2,4,8,16], index: 12, kind: output, shape index: {1}]  }
   0x1   :  { %3237 = sst [smem:[#allocation42_spill]] %s3197_s0 }
   0x2   :  { %3238 = sst [smem:[#allocation43_spill]] %s3198_s1 }
   0x3   :  { %3239 = sst [smem:[#allocation44_spill]] %s3199_s2 }
   0x4   :  { %3240 = sst [smem:[#allocation45_spill]] %s3200_s3 }
   0x5   :  { %3241 = sst [smem:[#allocation46_spill]] %s3202_s5 }
   0x6   :  { %3242 = sst [smem:[#allocation47_spill]] %s3204_s7 }
   0x7   :  { %3243 = sst [smem:[#allocation48_spill]] %s3206_s9 }
   0x8   :  { %3244 = sst [smem:[#allocation49_spill]] %s3208_s11 }
   0x9   :  { %3245 = sst [smem:[#allocation50_spill]] %s3209_s12 }
   0xa   :  { %18 = vsyncpa [#allocation7], 0 }
   0xb   :  { %20 = vsyncpa [#allocation7 + $0x1], 0 }
   0xc   :  { %21 = vsyncpa [#allocation10], 0 }
   0xd   :  { %23 = vsyncpa [#allocation10 + $0x1], 0 }
   0xe   :  { %24 = vsyncpa [#allocation13], 0 }
   0xf   :  { %25 = vsyncpa [#allocation16], 0 }
  0x10   :  { %26 = vsyncpa [#allocation19], 0 }
  0x11   :  { %27 = vsyncpa [#allocation22], 0 }
  0x12   :  { %28 = vsyncpa [#allocation8], 0 }
  0x13   :  { %30 = vsyncpa [#allocation8 + $0x1], 0 }
  0x14   :  { %31 = vsyncpa [#allocation26], 0 }
  0x15   :  { %33 = vsyncpa [#allocation26 + $0x1], 0  ;;  %s2590_s21 = smov 0   ;;  %s2592_s22 = smov 0  }
  0x16   :  { %s2594_s23 = smov 0   ;;  %s2596_s24 = smov 0  }
  0x17   :  { %s2598_s25 = smov 0   ;;  %s2600_s26 = smov 0  }
  0x18 LB: > { %3246 = sst [smem:[#allocation35_spill]] %s2483_s23  ;;  %s2621_s27 = sadd.s32 4294967295, %s2495_s26   ;;  %s2495_s26 = sphi %s2600_s26, %s39_s26   ;;  %s2491_s25 = sphi %s2598_s25, %s3305_s25   ;;  %s2487_s24 = sphi %s2596_s24, %s3304_s24   ;;  %s2483_s23 = sphi %s2594_s23, %s3300_s23   ;;  %s2479_s22 = sphi %s2592_s22, %s3303_s22   ;;  %s2475_s21 = sphi %s2590_s21, %s3302_s21  }
  0x19   : > { %3247 = sst [smem:[#allocation36_spill]] %s2487_s24  ;;  %p1682_p0 = scmp.ge.s32.totalorder %s2495_s26, 1 }
  0x1a   : > { %3248 = sst [smem:[#allocation37_spill]] %s2495_s26  ;;  %p3216_p1 = scmp.eq.s32.totalorder %s2621_s27, 0 }
  0x1b   : > { %p360_p2 = scmp.lt.s32.totalorder %s2495_s26, 3  ;;  %s2497_s29 = smov [#allocation12]  }
  0x1c   : > { %s372_s30 = sshll.u32 %s2497_s29, 4  ;;  %s2498_s14 = smov [#allocation15]   ;;  %s2630_s30 = int_to_ptr.vmem [resolvable:$true] %s372_s30 }
  0x1d   : > { %p2626_p3 = pnand %p1682_p0, %p360_p2  ;;  %s396_s15 = sshll.u32 %s2498_s14, 4  ;;  %s2641_s15 = int_to_ptr.vmem [resolvable:$true] %s396_s15 }
  0x1e   : > { %s2499_s16 = smov [#allocation18]   ;;  %s3252_s3 = sld [smem:[#allocation45_spill]] }
  0x1f   : > { %s3249_s28 = scalar_select %p2626_p3, 1, 0 }
  0x20   : > { %p1891_p4 = pneg %p2626_p3  ;;  %s2643_s17 = sshll.u32 %s2499_s16, 4  ;;  %s421_s17 = int_to_ptr.vmem [resolvable:$true] %s2643_s17 }
  0x21   : > { %3250 = sst [smem:[#allocation38_spill]] %s3249_s28 }
  0x22   : > { %p2637_p6 = pnand %p1891_p4, %p3216_p1 }
  0x24   : > { %s3251_s13 = scalar_select %p2637_p6, 1, 0 }
  0x25   : > { %s2047_s20 = scalar_lea.hbm %s3252_s3, 256  ;;  %p2653_p8 = pneg %p2637_p6 }
  0x26   : > { %p2048_p7 = scmp.ne.s32.totalorder %s3252_s3, %s2047_s20  ;;  %p2054_p11 = scmp.lt.u32.totalorder %s2047_s20, %s3252_s3 }
  0x27   : > { %s3253_s12 = scalar_select %p2653_p8, 1, 0 }
  0x28   : > { %p2050_p9 = pnand %p2653_p8, %p2048_p7 }
  0x2a   : > { %p2051_p10 = pneg %p2050_p9 }
  0x2c   : > { %p2056_p12 = pnand %p2054_p11, %p2051_p10 }
  0x2e   : > { %2059 = shalt.err (!%p2056_p12)
}
  0x2f   : > { %s2060_s11 = scalar_lea.vmem %s2630_s30, 256  ;;  %p2068_p4 = scmp.lt.s32.totalorder %s2630_s30, %s2630_s30 }
  0x30   : > { %p2061_p13 = scmp.ne.s32.totalorder %s2630_s30, %s2060_s11  ;;  %p2069_p5 = scmp.lt.s32.totalorder %s2060_s11, %s2060_s11 }
  0x32   : > { %p2063_p0 = pnand %p2061_p13, %p2653_p8  ;;  %p2070_p7 = por %p2069_p5, %p2068_p4 }
  0x34   : > { %p2064_p2 = pneg %p2063_p0 }
  0x36   : > { %p2071_p9 = pnand %p2070_p7, %p2064_p2 }
  0x38   : > { %2074 = shalt.err (!%p2071_p9)
}
  0x39   : > { %s3218_s18 = smov 64   ;;  %s3219_s19 = smov 4  }
  0x3a   : > { %1894 = dma.hbm_to_vmem [thread:$0]  (!%p2637_p6), %s3252_s3, 256, %s2630_s30, [#allocation13], %s3218_s18, %s3218_s18, %s3219_s19  }
  0x3b   : > { %s3254_s5 = sld [smem:[#allocation46_spill]] }
  0x41   : > { %s2075_s11 = scalar_lea.hbm %s3254_s5, 256 }
  0x42   : > { %p2076_p5 = scmp.ne.s32.totalorder %s3254_s5, %s2075_s11  ;;  %p2082_p12 = scmp.lt.u32.totalorder %s2075_s11, %s3254_s5 }
  0x44   : > { %p2078_p10 = pnand %p2076_p5, %p2653_p8 }
  0x46   : > { %p2079_p11 = pneg %p2078_p10 }
  0x48   : > { %p2084_p13 = pnand %p2082_p12, %p2079_p11 }
  0x4a   : > { %2087 = shalt.err (!%p2084_p13)
}
  0x4b   : > { %s2088_s30 = scalar_lea.vmem %s2641_s15, 256  ;;  %p2096_p7 = scmp.lt.s32.totalorder %s2641_s15, %s2641_s15 }
  0x4c   : > { %p2089_p0 = scmp.ne.s32.totalorder %s2641_s15, %s2088_s30  ;;  %p2097_p9 = scmp.lt.s32.totalorder %s2088_s30, %s2088_s30 }
  0x4e   : > { %p2091_p2 = pnand %p2089_p0, %p2653_p8  ;;  %p2098_p5 = por %p2097_p9, %p2096_p7 }
  0x50   : > { %p2092_p4 = pneg %p2091_p2 }
  0x52   : > { %p2099_p10 = pnand %p2098_p5, %p2092_p4 }
  0x54   : > { %2102 = shalt.err (!%p2099_p10)
}
  0x55   : > { %1900 = dma.hbm_to_vmem [thread:$0]  (!%p2637_p6), %s3254_s5, 256, %s2641_s15, [#allocation16], %s3218_s18, %s3218_s18, %s3219_s19  }
  0x56   : > { %s3255_s7 = sld [smem:[#allocation47_spill]] }
  0x5c   : > { %s2103_s20 = scalar_lea.hbm %s3255_s7, 256 }
  0x5d   : > { %p2104_p11 = scmp.ne.s32.totalorder %s3255_s7, %s2103_s20  ;;  %p2110_p0 = scmp.lt.u32.totalorder %s2103_s20, %s3255_s7 }
  0x5f   : > { %p2106_p12 = pnand %p2104_p11, %p2653_p8 }
  0x61   : > { %p2107_p13 = pneg %p2106_p12 }
  0x63   : > { %p2112_p2 = pnand %p2110_p0, %p2107_p13 }
  0x65   : > { %2115 = shalt.err (!%p2112_p2)
}
  0x66   : > { %s2116_s30 = scalar_lea.vmem %s421_s17, 256  ;;  %p2124_p5 = scmp.lt.s32.totalorder %s421_s17, %s421_s17 }
  0x67   : > { %p2117_p4 = scmp.ne.s32.totalorder %s421_s17, %s2116_s30  ;;  %p2125_p10 = scmp.lt.s32.totalorder %s2116_s30, %s2116_s30 }
  0x69   : > { %p2119_p7 = pnand %p2117_p4, %p2653_p8  ;;  %p2126_p1 = por %p2125_p10, %p2124_p5 }
  0x6b   : > { %p2120_p9 = pneg %p2119_p7 }
  0x6d   : > { %p2127_p3 = pnand %p2126_p1, %p2120_p9 }
  0x6f   : > { %2130 = shalt.err (!%p2127_p3)
}
  0x70   : > { %1906 = dma.hbm_to_vmem [thread:$0]  (!%p2637_p6), %s3255_s7, 256, %s421_s17, [#allocation19], %s3218_s18, %s3218_s18, %s3219_s19  }
  0x71   : > { %s2502_s2 = smov [#allocation21]   ;;  %s3256_s9 = sld [smem:[#allocation48_spill]] }
  0x72   : > { %s445_s24 = sshll.u32 %s2502_s2, 4  ;;  %s446_s24 = int_to_ptr.vmem [resolvable:$true] %s445_s24 }
  0x77   : > { %s2131_s29 = scalar_lea.hbm %s3256_s9, 16 }
  0x78   : > { %p2132_p1 = scmp.ne.s32.totalorder %s3256_s9, %s2131_s29  ;;  %p2138_p12 = scmp.lt.u32.totalorder %s2131_s29, %s3256_s9 }
  0x7a   : > { %p2134_p3 = pnand %p2132_p1, %p2653_p8 }
  0x7c   : > { %p2135_p11 = pneg %p2134_p3 }
  0x7e   : > { %p2140_p13 = pnand %p2138_p12, %p2135_p11 }
  0x80   : > { %2143 = shalt.err (!%p2140_p13)
}
  0x81   : > { %s2144_s17 = scalar_lea.vmem %s446_s24, 16  ;;  %s2151_s15 = scalar_lea.vmem %s446_s24, 32 }
  0x82   : > { %p2145_p0 = scmp.ne.s32.totalorder %s446_s24, %s2144_s17  ;;  %p2152_p7 = scmp.lt.s32.totalorder %s446_s24, %s446_s24 }
  0x83   : > { %p2153_p9 = scmp.lt.s32.totalorder %s2151_s15, %s2144_s17 }
  0x84   : > { %p2147_p2 = pnand %p2145_p0, %p2653_p8 }
  0x85   : > { %p2154_p5 = por %p2153_p9, %p2152_p7 }
  0x86   : > { %p2148_p4 = pneg %p2147_p2 }
  0x88   : > { %p2155_p10 = pnand %p2154_p5, %p2148_p4 }
  0x8a   : > { %2158 = shalt.err (!%p2155_p10)
}
  0x8b   : > { %1912 = dma.hbm_to_vmem [thread:$0]  (!%p2637_p6), %s3256_s9, 16, %s446_s24, [#allocation22]  }
  0x8c   : > { %s1681_s28 = sadd.s32 4294967294, %s2495_s26   ;;  %s51_s20 = sadd.s32 1, %s2491_s25 }
  0x8d   : > { %p53_p1 = scmp.ge.s32.totalorder %s51_s20, 2  ;;  %s60_s29 = sadd.s32 1, %s2483_s23 }
  0x8e   : > { %p67_p3 = scmp.ne.s32.totalorder %s2483_s23, %s2479_s22  ;;  %p68_p11 = scmp.eq.s32.totalorder %s2495_s26, 0 }
  0x8f   : > { %s3307_s20 = smov (%p53_p1, %s51_s20), 0  ;;  %p73_p13 = scmp.ne.s32.totalorder %s2479_s22, %s2475_s21 }
  0x90   : > { %3257 = sst [smem:[#allocation39_spill]] %s3307_s20  ;;  %p2751_p12 = por %p68_p11, %p67_p3 }
  0x91   : > { %s55_s24 = ssub.s32 %s2491_s25, %s3307_s20  ;;  %p319_p0 = scmp.eq.s32.totalorder %s2621_s27, 1 }
  0x92   : > { %p58_p2 = scmp.eq.s32.totalorder %s55_s24, 0  ;;  %p3259_p4 = scmp.eq.s32.totalorder %s2621_s27, 0 }
  0x93   : > { %p2766_p9 = por %p319_p0, %p67_p3  ;;  %p325_p5 = scmp.eq.s32.totalorder %s1681_s28, 1 }
  0x94   : > { %p2762_p7 = por %p3259_p4, %p73_p13  ;;  %p1941_p1 = scmp.lt.s32.totalorder %s2495_s26, 2 }
  0x95   : > { %s3261_s11 = scalar_select %p2766_p9, 1, 0 }
  0x96   : > { %s3260_s16 = scalar_select %p2762_p7, 1, 0 }
  0x97   : > { %s2771_s30 = scalar_select %p58_p2, %s2483_s23, %s60_s29  }
  0x98   : > { %p2773_p10 = por %p325_p5, %p73_p13  ;;  %s2779_s15 = sand.u32 1, %s2483_s23  }
  0x99   : > { %3262 = sst [smem:[#allocation40_spill]] %s2771_s30  ;;  %s3221_s0 = sshll.u32 %s2491_s25, 7 }
  0x9a   : > { %s3263_s17 = scalar_select %p2773_p10, 1, 0 }
  0x9b   : > { %s3220_s2 = sshll.u32 %s2779_s15, 3  ;;  %p2785_p11 = pnand %p1941_p1, %p2751_p12 }
  0x9c   : > { %3264 = sst [smem:[#allocation41_spill]] %s3263_s17  ;;  %s486_s28 = sand.u32 1, %s2495_s26  }
  0x9d   : > { %s3265_s24 = scalar_select %p2785_p11, 1, 0 }
  0x9e   : > { %s3266_s1 = sld [smem:[#allocation43_spill]]  ;;  %s490_s3 = scalar_lea.vmem [#allocation9], %s3220_s2 }
  0x9f   : > { %s497_s5 = sshll.u32 %s490_s3, 4  ;;  %s2801_s14 = scalar_lea.sflag [#allocation10], %s486_s28  ;;  %s2799_s5 = int_to_ptr.vmem [resolvable:$true] %s497_s5 }
  0xa0   : > { %p2807_p12 = pneg %p2785_p11 }
  0xa2   : > { %s3267_s9 = scalar_select %p2807_p12, 1, 0 }
  0xa4   : > { %s2795_s19 = scalar_lea.hbm %s3266_s1, %s3221_s0  ;;  %s2164_s2 = scalar_lea.hbm %s3266_s1, 256 }
  0xa5   : > { %s2159_s7 = scalar_lea.hbm %s2795_s19, 128  ;;  %p2165_p2 = scmp.lt.u32.totalorder %s2795_s19, %s3266_s1 }
  0xa6   : > { %p2160_p3 = scmp.ne.s32.totalorder %s2795_s19, %s2159_s7  ;;  %p2166_p4 = scmp.lt.u32.totalorder %s2164_s2, %s2159_s7 }
  0xa7   : > { %p2168_p1 = scmp.lt.u32.totalorder %s2159_s7, %s2795_s19 }
  0xa8   : > { %p2162_p13 = pnand %p2807_p12, %p2160_p3  ;;  %p2167_p5 = por %p2166_p4, %p2165_p2 }
  0xaa   : > { %p2163_p0 = pneg %p2162_p13  ;;  %p2169_p10 = por %p2168_p1, %p2167_p5 }
  0xac   : > { %p2170_p9 = pnand %p2169_p10, %p2163_p0 }
  0xae   : > { %2173 = shalt.err (!%p2170_p9)
}
  0xaf   : > { %s2174_s28 = scalar_lea.vmem %s2799_s5, 128  ;;  %s2503_s18 = smov [#allocation9]  }
  0xb0   : > { %p2175_p3 = scmp.ne.s32.totalorder %s2799_s5, %s2174_s28  ;;  %s2179_s29 = sshll.u32 %s2503_s18, 4  ;;  %s2180_s29 = int_to_ptr.vmem [resolvable:$false] %s2179_s29 }
  0xb1   : > { %s2181_s0 = scalar_lea.vmem %s2180_s29, 256  ;;  %p2182_p6 = scmp.lt.s32.totalorder %s2799_s5, %s2180_s29 }
  0xb2   : > { %p2177_p13 = pnand %p2175_p3, %p2807_p12  ;;  %p2183_p8 = scmp.lt.s32.totalorder %s2181_s0, %s2174_s28 }
  0xb4   : > { %p2178_p7 = pneg %p2177_p13  ;;  %p2184_p2 = por %p2183_p8, %p2182_p6 }
  0xb6   : > { %p2185_p4 = pnand %p2184_p2, %p2178_p7 }
  0xb8   : > { %2188 = shalt.err (!%p2185_p4)
}
  0xb9   : > { %s3268_s7 = smov 4   ;;  %s3269_s2 = smov 64  }
  0xba   : > { %1922 = dma.hbm_to_vmem [thread:$0]  (!%p2785_p11), %s2795_s19, 128, %s2799_s5, %s2801_s14, %s3269_s2, %s3269_s2, %s3268_s7  }
  0xbb   : > { %s2504_s3 = smov [#allocation14]   ;;  %s2505_s18 = smov [#allocation17]  }
  0xbc   : > { %s386_s1 = sshll.u32 %s2504_s3, 4  ;;  %s410_s20 = sshll.u32 %s2505_s18, 4  ;;  %s387_s1 = int_to_ptr.vmem [resolvable:$true] %s386_s1  ;;  %s411_s20 = int_to_ptr.vmem [resolvable:$true] %s410_s20 }
  0xbd   : > { %s2189_s0 = scalar_lea.hbm %s3201_s4, 16  ;;  %p3270_p8 = scmp.ne.s32.totalorder %s3253_s12, 0 }
  0xbe   : > { %p2190_p6 = scmp.ne.s32.totalorder %s3201_s4, %s2189_s0  ;;  %p2196_p10 = scmp.lt.u32.totalorder %s2189_s0, %s3201_s4 }
  0xc0   : > { %p2192_p7 = pnand %p2190_p6, %p3270_p8 }
  0xc2   : > { %p2193_p9 = pneg %p2192_p7 }
  0xc4   : > { %p2198_p0 = pnand %p2196_p10, %p2193_p9 }
  0xc6   : > { %2201 = shalt.err (!%p2198_p0)
}
  0xc7   : > { %s2202_s5 = scalar_lea.vmem %s387_s1, 16  ;;  %s2209_s19 = scalar_lea.vmem %s387_s1, 32 }
  0xc8   : > { %p2203_p5 = scmp.ne.s32.totalorder %s387_s1, %s2202_s5  ;;  %p2210_p13 = scmp.lt.s32.totalorder %s387_s1, %s387_s1 }
  0xc9   : > { %p2211_p2 = scmp.lt.s32.totalorder %s2209_s19, %s2202_s5 }
  0xca   : > { %p2205_p1 = pnand %p2203_p5, %p3270_p8 }
  0xcb   : > { %p2212_p4 = por %p2211_p2, %p2210_p13 }
  0xcc   : > { %p2206_p3 = pneg %p2205_p1 }
  0xce   : > { %p2213_p11 = pnand %p2212_p4, %p2206_p3 }
  0xd0   : > { %2216 = shalt.err (!%p2213_p11)
}
  0xd1   : > { %p3271_p6 = scmp.ne.s32.totalorder %s3251_s13, 0  ;;  %s2217_s7 = scalar_lea.hbm %s3203_s6, 16 }
  0xd2   : > { %p2218_p7 = scmp.ne.s32.totalorder %s3203_s6, %s2217_s7  ;;  %p2224_p11 = scmp.lt.u32.totalorder %s2217_s7, %s3203_s6 }
  0xd3   : > { %1897 = dma.hbm_to_vmem [thread:$0]  (!%p3271_p6), %s3201_s4, 16, %s387_s1, [#allocation13]  }
  0xd4   : > { %p2220_p9 = pnand %p2218_p7, %p3270_p8 }
  0xd6   : > { %p2221_p10 = pneg %p2220_p9 }
  0xd8   : > { %p2226_p0 = pnand %p2224_p11, %p2221_p10 }
  0xda   : > { %2229 = shalt.err (!%p2226_p0)
}
  0xdb   : > { %s2230_s28 = scalar_lea.vmem %s411_s20, 16  ;;  %s2237_s1 = scalar_lea.vmem %s411_s20, 32 }
  0xdc   : > { %p2231_p5 = scmp.ne.s32.totalorder %s411_s20, %s2230_s28  ;;  %p2238_p13 = scmp.lt.s32.totalorder %s411_s20, %s411_s20 }
  0xdd   : > { %p2239_p2 = scmp.lt.s32.totalorder %s2237_s1, %s2230_s28 }
  0xde   : > { %p2233_p1 = pnand %p2231_p5, %p3270_p8 }
  0xdf   : > { %p2240_p4 = por %p2239_p2, %p2238_p13 }
  0xe0   : > { %p2234_p3 = pneg %p2233_p1 }
  0xe2   : > { %p2241_p12 = pnand %p2240_p4, %p2234_p3 }
  0xe4   : > { %2244 = shalt.err (!%p2241_p12)
}
  0xe5   : > { %1903 = dma.hbm_to_vmem [thread:$0]  (!%p3271_p6), %s3203_s6, 16, %s411_s20, [#allocation16]  }
  0xe6   : > { %s2506_s19 = smov [#allocation20]   ;;  %s2507_s30 = smov [#allocation23]  }
  0xe7   : > { %s434_s23 = sshll.u32 %s2506_s19, 4  ;;  %s456_s26 = sshll.u32 %s2507_s30, 4  ;;  %s435_s23 = int_to_ptr.vmem [resolvable:$true] %s434_s23  ;;  %s457_s26 = int_to_ptr.vmem [resolvable:$true] %s456_s26 }
  0xe8   : > { %s2245_s2 = scalar_lea.hbm %s3205_s8, 16 }
  0xe9   : > { %p2246_p12 = scmp.ne.s32.totalorder %s3205_s8, %s2245_s2  ;;  %p2252_p10 = scmp.lt.u32.totalorder %s2245_s2, %s3205_s8 }
  0xeb   : > { %p2248_p7 = pnand %p2246_p12, %p3270_p8 }
  0xed   : > { %p2249_p9 = pneg %p2248_p7 }
  0xef   : > { %p2254_p11 = pnand %p2252_p10, %p2249_p9 }
  0xf1   : > { %2257 = shalt.err (!%p2254_p11)
}
  0xf2   : > { %s2258_s20 = scalar_lea.vmem %s435_s23, 16  ;;  %s2265_s1 = scalar_lea.vmem %s435_s23, 32 }
  0xf3   : > { %p2259_p0 = scmp.ne.s32.totalorder %s435_s23, %s2258_s20  ;;  %p2266_p3 = scmp.lt.s32.totalorder %s435_s23, %s435_s23 }
  0xf4   : > { %p2267_p13 = scmp.lt.s32.totalorder %s2265_s1, %s2258_s20 }
  0xf5   : > { %p2261_p5 = pnand %p2259_p0, %p3270_p8 }
  0xf6   : > { %p2268_p2 = por %p2267_p13, %p2266_p3 }
  0xf7   : > { %p2262_p1 = pneg %p2261_p5 }
  0xf9   : > { %p2269_p4 = pnand %p2268_p2, %p2262_p1 }
  0xfb   : > { %2272 = shalt.err (!%p2269_p4)
}
  0xfc   : > { %1909 = dma.hbm_to_vmem [thread:$0]  (!%p3271_p6), %s3205_s8, 16, %s435_s23, [#allocation19]  }
  0xfd   : > { %s2273_s17 = scalar_lea.hbm %s3207_s10, 16 }
  0xfe   : > { %p2274_p12 = scmp.ne.s32.totalorder %s3207_s10, %s2273_s17  ;;  %p2280_p10 = scmp.lt.u32.totalorder %s2273_s17, %s3207_s10 }
 0x100   : > { %p2276_p7 = pnand %p2274_p12, %p3270_p8 }
 0x102   : > { %p2277_p9 = pneg %p2276_p7 }
 0x104   : > { %p2282_p11 = pnand %p2280_p10, %p2277_p9 }
 0x106   : > { %2285 = shalt.err (!%p2282_p11)
}
 0x107   : > { %s2286_s29 = scalar_lea.vmem %s457_s26, 16  ;;  %s2293_s23 = scalar_lea.vmem %s457_s26, 32 }
 0x108   : > { %p2287_p0 = scmp.ne.s32.totalorder %s457_s26, %s2286_s29  ;;  %p2294_p3 = scmp.lt.s32.totalorder %s457_s26, %s457_s26 }
 0x109   : > { %p2295_p13 = scmp.lt.s32.totalorder %s2293_s23, %s2286_s29 }
 0x10a   : > { %p2289_p5 = pnand %p2287_p0, %p3270_p8 }
 0x10b   : > { %p2296_p2 = por %p2295_p13, %p2294_p3 }
 0x10c   : > { %p2290_p1 = pneg %p2289_p5 }
 0x10e   : > { %p2297_p4 = pnand %p2296_p2, %p2290_p1 }
 0x110   : > { %2300 = shalt.err (!%p2297_p4)
}
 0x111   : > { %1915 = dma.hbm_to_vmem [thread:$0]  (!%p3271_p6), %s3207_s10, 16, %s457_s26, [#allocation22]  }
 0x112   : > { %s3272_s12 = sshll.u32 %s2491_s25, 7  ;;  %s3273_s5 = sld [smem:[#allocation42_spill]] }
 0x113   : > { %s3274_s30 = sshll.u32 %s2779_s15, 3  ;;  %s1697_s7 = sshll.u32 %s2491_s25, 4 }
 0x114   : > { %s471_s13 = scalar_lea.vmem [#allocation6], %s3274_s30  ;;  %s468_s2 = scalar_lea.sflag [#allocation7], %s2779_s15 }
 0x115   : > { %s479_s17 = sshll.u32 %s471_s13, 4  ;;  %p3275_p6 = scmp.ne.s32.totalorder %s3267_s9, 0  ;;  %s2915_s17 = int_to_ptr.vmem [resolvable:$true] %s479_s17 }
 0x118   : > { %s2911_s19 = scalar_lea.hbm %s3273_s5, %s3272_s12  ;;  %s2306_s29 = scalar_lea.hbm %s3273_s5, 256 }
 0x119   : > { %s2301_s3 = scalar_lea.hbm %s2911_s19, 128  ;;  %p2307_p9 = scmp.lt.u32.totalorder %s2911_s19, %s3273_s5 }
 0x11a   : > { %p2302_p8 = scmp.ne.s32.totalorder %s2911_s19, %s2301_s3  ;;  %p2308_p10 = scmp.lt.u32.totalorder %s2306_s29, %s2301_s3 }
 0x11b   : > { %p2310_p0 = scmp.lt.u32.totalorder %s2301_s3, %s2911_s19 }
 0x11c   : > { %p2304_p12 = pnand %p2302_p8, %p3275_p6  ;;  %p2309_p11 = por %p2308_p10, %p2307_p9 }
 0x11e   : > { %p2305_p7 = pneg %p2304_p12  ;;  %p2311_p5 = por %p2310_p0, %p2309_p11 }
 0x120   : > { %p2312_p1 = pnand %p2311_p5, %p2305_p7 }
 0x122   : > { %2315 = shalt.err (!%p2312_p1)
}
 0x123   : > { %s2316_s20 = scalar_lea.vmem %s2915_s17, 128  ;;  %s2508_s12 = smov [#allocation6]  }
 0x124   : > { %p2317_p3 = scmp.ne.s32.totalorder %s2915_s17, %s2316_s20  ;;  %s2321_s1 = sshll.u32 %s2508_s12, 4  ;;  %s2322_s1 = int_to_ptr.vmem [resolvable:$false] %s2321_s1 }
 0x125   : > { %s2323_s0 = scalar_lea.vmem %s2322_s1, 256  ;;  %p2324_p4 = scmp.lt.s32.totalorder %s2915_s17, %s2322_s1 }
 0x126   : > { %p2319_p13 = pnand %p2317_p3, %p3275_p6  ;;  %p2325_p8 = scmp.lt.s32.totalorder %s2323_s0, %s2316_s20 }
 0x128   : > { %p2320_p2 = pneg %p2319_p13  ;;  %p2326_p12 = por %p2325_p8, %p2324_p4 }
 0x12a   : > { %p2327_p9 = pnand %p2326_p12, %p2320_p2 }
 0x12c   : > { %2330 = shalt.err (!%p2327_p9)
}
 0x12d   : > { %p3276_p7 = scmp.ne.s32.totalorder %s3265_s24, 0  ;;  %s3277_s3 = sld [smem:[#allocation44_spill]] }
 0x12e   : > { %s510_s18 = scalar_lea.vmem [#allocation11], %s2779_s15 }
 0x12f   : > { %1919 = dma.hbm_to_vmem [thread:$0]  (!%p3276_p7), %s2911_s19, 128, %s2915_s17, %s468_s2  }
 0x130   : > { %s517_s29 = sshll.u32 %s510_s18, 4  ;;  %s518_s29 = int_to_ptr.vmem [resolvable:$true] %s517_s29 }
 0x133   : > { %s2945_s26 = scalar_lea.hbm %s3277_s3, %s1697_s7  ;;  %s2336_s17 = scalar_lea.hbm %s3277_s3, 32 }
 0x134   : > { %s2331_s23 = scalar_lea.hbm %s2945_s26, 16  ;;  %p2337_p5 = scmp.lt.u32.totalorder %s2945_s26, %s3277_s3 }
 0x135   : > { %p2332_p10 = scmp.ne.s32.totalorder %s2945_s26, %s2331_s23  ;;  %p2338_p1 = scmp.lt.u32.totalorder %s2336_s17, %s2331_s23 }
 0x136   : > { %p2340_p13 = scmp.lt.u32.totalorder %s2331_s23, %s2945_s26 }
 0x137   : > { %p2334_p11 = pnand %p2332_p10, %p3275_p6  ;;  %p2339_p3 = por %p2338_p1, %p2337_p5 }
 0x139   : > { %p2335_p0 = pneg %p2334_p11  ;;  %p2341_p2 = por %p2340_p13, %p2339_p3 }
 0x13b   : > { %p2342_p4 = pnand %p2341_p2, %p2335_p0 }
 0x13d   : > { %2345 = shalt.err (!%p2342_p4)
}
 0x13e   : > { %s2346_s15 = scalar_lea.vmem %s518_s29, 16  ;;  %s2509_s7 = smov [#allocation11]  }
 0x13f   : > { %p2347_p8 = scmp.ne.s32.totalorder %s518_s29, %s2346_s15  ;;  %s2351_s12 = sshll.u32 %s2509_s7, 4  ;;  %s2352_s12 = int_to_ptr.vmem [resolvable:$false] %s2351_s12 }
 0x140   : > { %s2353_s1 = scalar_lea.vmem %s2352_s12, 32  ;;  %p2354_p10 = scmp.lt.s32.totalorder %s518_s29, %s2352_s12 }
 0x141   : > { %p2349_p12 = pnand %p2347_p8, %p3275_p6  ;;  %p2355_p11 = scmp.lt.s32.totalorder %s2353_s1, %s2346_s15 }
 0x143   : > { %p2350_p9 = pneg %p2349_p12  ;;  %p2356_p7 = por %p2355_p11, %p2354_p10 }
 0x145   : > { %p2357_p1 = pnand %p2356_p7, %p2350_p9 }
 0x147   : > { %2360 = shalt.err (!%p2357_p1)
}
 0x148   : > { %p3278_p5 = scmp.ne.s32.totalorder %s3265_s24, 0  ;;  %s3279_s0 = sld [smem:[#allocation38_spill]] }
 0x14a   : > { %1925 = dma.hbm_to_vmem [thread:$0]  (!%p3278_p5), %s2945_s26, 16, %s518_s29, %s2801_s14  }
 0x14e   : > { %p3280_p0 = scmp.ne.s32.totalorder %s3279_s0, 0 }
 0x14f   : > { %s2969_s9 = sand.u32 (!%p3280_p0), 1, %s2479_s22   ;;  %p3281_p6 = scmp.ne.s32.totalorder (!%p3280_p0), %s3260_s16, 0 }
 0x150   : > { %526 = sbr.rel (%p3280_p0) target bundleno = 1989 (0x7c5), region = 64  ;;  %s2972_s30 = sshll.u32 (!%p3280_p0), %s2969_s9, 3 }
 0x151   : > { %s529_s13 = scalar_lea.sflag (!%p3280_p0), [#allocation7], %s2969_s9  ;;  %s532_s18 = scalar_lea.vmem (!%p3280_p0), [#allocation6], %s2972_s30 }
 0x157   : > { %2442 = dma.done.wait (%p3281_p6), %s529_s13, 128  }
 0x158   : > { %2444 = vsyncadd (%p3281_p6), %s529_s13, 4294967168  ;;  %s537_s24 = sand.u32 1, %s2621_s27   ;;  %s541_s26 = scalar_lea.vmem [#allocation9], %s2972_s30 }
 0x159   : > { %s538_s14 = scalar_lea.sflag [#allocation10], %s537_s24 }
 0x15a   : > { %2446 = dma.done.wait (%p3281_p6), %s538_s14, 144  }
 0x15b   : > { %2448 = vsyncadd (%p3281_p6), %s538_s14, 4294967152  ;;  %s549_s29 = scalar_lea.vmem [#allocation11], %s2969_s9  ;;  %p3282_p7 = scmp.eq.s32.totalorder %s2621_s27, 0 }
 0x15d   : > { %2450 = dma.done.wait (%p3282_p7), [#allocation13], 272   ;;  %p3283_p3 = pmov %p3282_p7 }
 0x15f   : > { %2452 = vsyncadd (%p3283_p3), [#allocation13], 4294967024  ;;  %p3284_p13 = pmov %p3283_p3 }
 0x160   : > { %p3285_p2 = pmov %p3283_p3 }
 0x161   : > { %2454 = dma.done.wait (%p3284_p13), [#allocation16], 272  }
 0x162   : > { %2456 = vsyncadd (%p3285_p2), [#allocation16], 4294967024  ;;  %p3286_p4 = pmov %p3285_p2 }
 0x163   : > { %p3287_p8 = pmov %p3285_p2 }
 0x164   : > { %2458 = dma.done.wait (%p3286_p4), [#allocation19], 272  }
 0x165   : > { %2460 = vsyncadd (%p3287_p8), [#allocation19], 4294967024  ;;  %p3288_p12 = pmov %p3285_p2 }
 0x166   : > { %p3289_p9 = pmov %p3285_p2 }
 0x167   : > { %2462 = dma.done.wait (%p3288_p12), [#allocation22], 32  }
 0x168   : > { %2464 = vsyncadd (%p3289_p9), [#allocation22], 4294967264  ;;  %v2510_v0 = vmov 0.0   ;;  %vm2511_vm0 = vmmov 0   ;;  %v2022_v1 = vld [vmem:[#allocation15] sm:$0xff]   ;;  %v2023_v2 = vld [vmem:[#allocation15 + $0x8] sm:$0xff]  }
 0x169   : > { %1777 = vmatprep.subr.bf16.mxu0 %v2510_v0  ;;  %1785 = vmatprep.subr.bf16.mxu1 %v2510_v0  ;;  %v2024_v3 = vld [vmem:[#allocation12] sm:$0xff]   ;;  %v2026_v4 = vld [vmem:[#allocation12 + $0x8] sm:$0xff]   ;;  %vm674_vm1 = vcmask 261120   ;;  %v1716_v10 = vld [vmem:[#allocation14] ss:$0 sm:$0xff]  ;;  %vm720_vm2 = vcmask 64512  }
 0x16a   : > { %1781 = vmatprep.mubr.msk.bf16.mxu0 %vm2511_vm0, %v2510_v0  ;;  %1789 = vmatprep.mubr.msk.bf16.mxu1 %vm2511_vm0, %v2510_v0  ;;  %v2025_v5 = vld [vmem:[%s541_s26] sm:$0xff]   ;;  %v3013_v6 = vld [vmem:[%s532_s18] sm:$0xff]  ;;  %vm825_vm3 = vcmask 60416   ;;  %s2512_s27 = smov 104   ;;  %s2513_s16 = smov 120   ;;  %vm1048_vm4 = vcmask 130048  }
 0x16b   : > { %1778 = vmatpush3.bf16.msra.mxu0 %v2022_v1  ;;  %1786 = vmatpush3.bf16.msra.mxu1 %v2024_v3  ;;  %v638_v7 = vpack.c.bf16 %v3013_v6, %v3013_v6  ;;  %v1711_v8 = vld [vmem:[#allocation17] ss:$0 sm:$0xff]  ;;  %s2514_s23 = smov 112   ;;  %s2515_s28 = smov 96   ;;  %v1721_v43 = vld [vmem:[%s549_s29] ss:$0 sm:$0xff] }
 0x16c   : > { %1779 = vmatprep.subr.bf16.mxu0 %v2510_v0  ;;  %1787 = vmatprep.subr.bf16.mxu1 %v2510_v0  ;;  %s1710_s19 = sshll.u32 %s2969_s9, 5  ;;  %s2516_s2 = smov 80   ;;  %vm1294_vm5 = vcmask 126016   ;;  %vm1303_vm6 = vcmask 191616   ;;  %vm1312_vm7 = vcmask 257216  }
 0x16d   : > { %s3065_s17 = scalar_lea.vmem [#allocation25], %s1710_s19  ;;  %s2517_s20 = smov 72  }
 0x16e   : > { %s2518_s15 = smov 88   ;;  %s2519_s7 = smov 16  }
 0x16f   : > { %1780 = vmatpush3.bf16.msra.mxu0 %v2023_v2  ;;  %1788 = vmatpush3.bf16.msra.mxu1 %v2026_v4  ;;  %s2520_s12 = smov 8   ;;  %s2521_s1 = smov 24  }
 0x170   : > { %1793 = vmatprep.subr.bf16.mxu0 %v2510_v0  ;;  %1799 = vmatprep.subr.bf16.mxu1 %v2510_v0  ;;  %s3290_s0 = sld [smem:[#allocation36_spill]]  ;;  %s1447_s13 = sshll.u32 %s3065_s17, 4  ;;  %s3109_s13 = int_to_ptr.vmem [resolvable:$true] %s1447_s13 }
 0x171   : > { %s3291_s26 = sld [smem:[#allocation50_spill]]  ;;  %p3293_p11 = scmp.ne.s32.totalorder %s3261_s11, 0 }
 0x172   : > { %1782 = vmatmul.mubr.msk.bf16.vlgmr.msra.gmra.mrb[0].mxu0 %vm674_vm1, %v2025_v5  ;;  %1790 = vmatmul.mubr.msk.bf16.vlgmr.msra.gmra.mrb[0].mxu1 %vm674_vm1, %v638_v7 }
 0x173   : > { %1795 = vmatprep.mubr.msk.bf16.mxu0 %vm2511_vm0, %v2510_v0  ;;  %1801 = vmatprep.mubr.msk.bf16.mxu1 %vm2511_vm0, %v2510_v0 }
 0x176   : > { %s1751_s18 = sshll.u32 %s3290_s0, 9 }
 0x177   : > { %s3292_s29 = smov %s3291_s26 }
 0x245   : > { %v712_v9 = vpop.f32.mrb[0].mxu0  ;;  %v818_v13 = vpop.f32.mrb[0].mxu1 }
 0x246   : > { %v1783_v11 = vpop.f32.mrb[1].mxu0  ;;  %v713_v14 = vadd.f32 %v1711_v8, %v712_v9  ;;  %v819_v17 = vadd.f32 %v1716_v10, %v818_v13  ;;  %v1791_v18 = vpop.f32.mrb[1].mxu1 }
 0x247   : > { %v715_v12 = vpop.f32.mrb[2].mxu0  ;;  %v821_v19 = vpop.f32.mrb[2].mxu1 }
 0x248   : > { %v716_v15 = vadd.f32 %v1711_v8, %v715_v12  ;;  %v1784_v16 = vpop.f32.mrb[3].mxu0  ;;  %v824_v21 = vpack.c.bf16 %v819_v17, %v819_v17  ;;  %v1792_v22 = vpop.f32.mrb[3].mxu1 }
 0x24a   : > { %v3025_v20 = vpack.c.bf16 %v716_v15, %v713_v14  ;;  %826 = vst.msk [vmem:[#allocation2] sm:$0xf] %vm825_vm3, %v824_v21 }
 0x24c   : > { %721 = vst.msk [vmem:[#allocation4] sm:$0xff] %vm720_vm2, %v3025_v20  ;;  %747 = vrot.lane.b32.xlu1 %v3025_v20, %s2512_s27  ;;  %727 = vrot.lane.b32.xlu0 %v3025_v20, %s2513_s16 }
 0x250   : > { %737 = vrot.lane.b32.xlu0 %v3025_v20, %s2514_s23  ;;  %830 = vrot.lane.b32.xlu1 %v824_v21, %s2513_s16  ;;  %s1419_s16 = scalar_lea.sflag [#allocation26], %s2969_s9 }
 0x251   : > { %v845_v25 = vld [vmem:[#allocation2] sm:$0xf] }
 0x253   : > { %v849_v23 = vld [vmem:[#allocation4] sm:$0xff] }
 0x254   : > { %835 = vrot.lane.b32.xlu0 %v824_v21, %s2514_s23  ;;  %840 = vrot.lane.b32.xlu1 %v824_v21, %s2512_s27  ;;  %v868_v24 = vsel %vm720_vm2, %v849_v23, 0  ;;  %s3115_s27 = scalar_lea.hbm %s3291_s26, %s1751_s18  ;;  %s2361_s23 = scalar_lea.vmem %s3109_s13, 512 }
 0x255   : > { %1794 = vmatpush3.bf16.xpose.msra.mxu0 %v868_v24  ;;  %p2362_p10 = scmp.ne.s32.totalorder %s3109_s13, %s2361_s23 }
 0x256   : > { %1805 = vmatprep.subr.bf16.mxu0 %v2510_v0 }
 0x257   : > { %p2363_p1 = pnand %p2362_p10, %p3293_p11 }
 0x258   : > { %723 = vrot.lane.b32.xlu1 %v3025_v20, %s2515_s28  ;;  %s2522_s28 = smov [#allocation25]  }
 0x259   : > { %p2364_p5 = pneg %p2363_p1  ;;  %s2365_s19 = sshll.u32 %s2522_s28, 4  ;;  %s2366_s19 = int_to_ptr.vmem [resolvable:$false] %s2365_s19 }
 0x25a   : > { %p2368_p0 = scmp.lt.s32.totalorder %s3109_s13, %s2366_s19 }
 0x25c   : > { %1796 = vmatmul.mubr.msk.bf16.vlgmr.msra.gmra.mrb[4].mxu0 %vm720_vm2, %v845_v25 }
 0x25d   : > { %1807 = vmatprep.mubr.msk.bf16.mxu0 %vm2511_vm0, %v2510_v0 }
 0x2be   : > { %v748_v26 = vpop.permute.xlu1 %747  ;;  %v728_v27 = vpop.permute.xlu0 %727 }
 0x2bf   : > { %751 = vst.msk [vmem:[#allocation4 + $0x18] sm:$0xff] %vm720_vm2, %v748_v26  ;;  %731 = vst.msk [vmem:[#allocation4 + $0x8] sm:$0xff] %vm720_vm2, %v728_v27 }
 0x2c2   : > { %v738_v28 = vpop.permute.xlu0 %737  ;;  %v831_v29 = vpop.permute.xlu1 %830 }
 0x2c3   : > { %741 = vst.msk [vmem:[#allocation4 + $0x10] sm:$0xff] %vm720_vm2, %v738_v28 }
 0x2c4   : > { %834 = vst.msk [vmem:[#allocation2 + $0x4] sm:$0xf] %vm825_vm3, %v831_v29 }
 0x2c6   : > { %v836_v30 = vpop.permute.xlu0 %835  ;;  %v841_v31 = vpop.permute.xlu1 %840  ;;  %v850_v32 = vld [vmem:[#allocation4 + $0x8] sm:$0xff]  ;;  %v852_v38 = vld [vmem:[#allocation4 + $0x18] sm:$0xff] }
 0x2c7   : > { %839 = vst.msk [vmem:[#allocation2 + $0x8] sm:$0xf] %vm825_vm3, %v836_v30  ;;  %844 = vst.msk [vmem:[#allocation2 + $0xc] sm:$0xf] %vm825_vm3, %v841_v31  ;;  %v914_v33 = vsel %vm720_vm2, %v850_v32, 0  ;;  %v1006_v39 = vsel %vm720_vm2, %v852_v38, 0 }
 0x2c8   : > { %1800 = vmatpush3.bf16.xpose.msra.mxu1 %v914_v33 }
 0x2c9   : > { %1811 = vmatprep.subr.bf16.mxu1 %v2510_v0 }
 0x2ca   : > { %v724_v34 = vpop.permute.xlu1 %723  ;;  %v851_v35 = vld [vmem:[#allocation4 + $0x10] sm:$0xff] }
 0x2cb   : > { %726 = vst.msk [vmem:[#allocation5] sm:$0xff] %vm720_vm2, %v724_v34  ;;  %v960_v36 = vsel %vm720_vm2, %v851_v35, 0  ;;  %v846_v37 = vld [vmem:[#allocation2 + $0x4] sm:$0xf] }
 0x2cc   : > { %1806 = vmatpush3.bf16.xpose.msra.mxu0 %v960_v36 }
 0x2cd   : > { %1817 = vmatprep.subr.bf16.mxu0 %v2510_v0 }
 0x2ce   : > { %v847_v40 = vld [vmem:[#allocation2 + $0x8] sm:$0xf]  ;;  %v848_v42 = vld [vmem:[#allocation2 + $0xc] sm:$0xf] }
 0x2cf   : > { %1802 = vmatmul.mubr.msk.bf16.vlgmr.msra.gmra.mrb[4].mxu1 %vm720_vm2, %v846_v37 }
 0x2d0   : > { %1812 = vmatpush3.bf16.xpose.msra.mxu1 %v1006_v39  ;;  %1813 = vmatprep.mubr.msk.bf16.mxu1 %vm2511_vm0, %v2510_v0 }
 0x2d1   : > { %1823 = vmatprep.subr.bf16.mxu1 %v2510_v0 }
 0x2d2   : > { %v853_v41 = vld [vmem:[#allocation5] sm:$0xff] }
 0x2d3   : > { %1808 = vmatmul.mubr.msk.bf16.vlgmr.msra.gmra.mrb[8].mxu0 %vm720_vm2, %v847_v40 }
 0x2d4   : > { %1818 = vmatpush3.bf16.msra.mxu0 %v853_v41  ;;  %1819 = vmatprep.mubr.msk.bf16.mxu0 %vm2511_vm0, %v2510_v0 }
 0x2d5   : > { %1829 = vmatprep.subr.bf16.mxu0 %v2510_v0 }
 0x2d7   : > { %1814 = vmatmul.mubr.msk.bf16.vlgmr.msra.gmra.mrb[8].mxu1 %vm720_vm2, %v848_v42 }
 0x2d8   : > { %1825 = vmatprep.mubr.msk.bf16.mxu1 %vm2511_vm0, %v2510_v0 }
 0x32f   : > { %v904_v44 = vpop.f32.mrb[4].mxu0 }
 0x330   : > { %v905_v45 = vadd.f32 %v1721_v43, %v904_v44  ;;  %v1797_v46 = vpop.f32.mrb[5].mxu0 }
 0x331   : > { %v907_v47 = vpop.f32.mrb[6].mxu0 }
 0x332   : > { %1049 = vst.msk [vmem:[%s3065_s17] sm:$0xff] %vm1048_vm4, %v905_v45  ;;  %v1798_v48 = vpop.f32.mrb[7].mxu0  ;;  %v1053_v49 = vsel %vm1048_vm4, %v905_v45, -inf }
 0x333   : > { %1054 = vmax.xlane.f32.xlu0 %v1053_v49 }
 0x3a2   : > { %v950_v50 = vpop.f32.mrb[4].mxu1 }
 0x3a3   : > { %v951_v51 = vadd.f32 %v1721_v43, %v950_v50  ;;  %v1803_v52 = vpop.f32.mrb[5].mxu1 }
 0x3a4   : > { %v953_v53 = vpop.f32.mrb[6].mxu1 }
 0x3a5   : > { %1050 = vst.msk [vmem:[%s3065_s17 + $0x8] sm:$0xff] %vm1048_vm4, %v951_v51  ;;  %v1804_v54 = vpop.f32.mrb[7].mxu1  ;;  %v1056_v55 = vsel %vm1048_vm4, %v951_v51, -inf  ;;  %v2027_v53 = vld [vmem:[#allocation18] sm:$0xff]  }
 0x3a6   : > { %v996_v56 = vpop.f32.mrb[8].mxu0  ;;  %1057 = vmax.xlane.f32.xlu1 %v1056_v55 }
 0x3a7   : > { %v997_v57 = vadd.f32 %v1721_v43, %v996_v56  ;;  %v1809_v58 = vpop.f32.mrb[9].mxu0 }
 0x3a8   : > { %v999_v59 = vpop.f32.mrb[10].mxu0 }
 0x3a9   : > { %1051 = vst.msk [vmem:[%s3065_s17 + $0x10] sm:$0xff] %vm1048_vm4, %v997_v57  ;;  %v1810_v60 = vpop.f32.mrb[11].mxu0  ;;  %v1059_v61 = vsel %vm1048_vm4, %v997_v57, -inf }
 0x3aa   : > { %1060 = vmax.xlane.f32.xlu0 %v1059_v61  ;;  %v1042_v62 = vpop.f32.mrb[8].mxu1  ;;  %v2028_v61 = vld [vmem:[#allocation18 + $0x8] sm:$0xff]  }
 0x3ab   : > { %v1043_v63 = vadd.f32 %v1721_v43, %v1042_v62  ;;  %v1815_v1 = vpop.f32.mrb[9].mxu1 }
 0x3ac   : > { %v1045_v2 = vpop.f32.mrb[10].mxu1 }
 0x3ad   : > { %1052 = vst.msk [vmem:[%s3065_s17 + $0x18] sm:$0xff] %vm1048_vm4, %v1043_v63  ;;  %v1816_v3 = vpop.f32.mrb[11].mxu1  ;;  %v1062_v4 = vsel %vm1048_vm4, %v1043_v63, -inf  ;;  %s2367_s17 = scalar_lea.vmem %s2366_s19, 1024 }
 0x3ae   : > { %1063 = vmax.xlane.f32.xlu0 %v1062_v4  ;;  %p2369_p6 = scmp.lt.s32.totalorder %s2367_s17, %s2361_s23 }
 0x3b0   : > { %p2370_p7 = por %p2369_p6, %p2368_p0 }
 0x3b2   : > { %p2371_p3 = pnand %p2370_p7, %p2364_p5 }
 0x3b7   : > { %742 = vrot.lane.b32.xlu1 %v3025_v20, %s2516_s2 }
 0x3bb   : > { %752 = vrot.lane.b32.xlu1 %v3025_v20, %s2517_s20 }
 0x3c0   : > { %v1055_v5 = vpop.xlane.xlu0 %1054 }
 0x3c1   : > { %v1065_v7 = vsub.f32 %v905_v45, %v1055_v5 }
 0x3c3   : > { %v1069_v8 = vpack.c.bf16 %v1065_v7, %v1065_v7 }
 0x3c4   : > { %732 = vrot.lane.b32.xlu0 %v3025_v20, %s2518_s15 }
 0x3c5   : > { %v1074_v9 = vmul.bf16 1069105081, %v1069_v8 }
 0x3c7   : > { %2029 = vpow.bf16 %v1074_v9 }
 0x3d2   : > { %v2030_v10 = vpop.eup %2029 }
 0x3d3   : > { %1820 = vmatmul.mubr.msk.bf16.vlgmr.msra.gmra.mrb[12].mxu0 %vm1048_vm4, %v2030_v10  ;;  %v1085_v38 = vunpack.c.l.bf16 %v2030_v10 }
 0x3d4   : > { %1831 = vmatprep.mubr.msk.bf16.mxu0 %vm2511_vm0, %v2510_v0 }
 0x3d5   : > { %v1089_v39 = vsel %vm1048_vm4, %v1085_v38, 0.0 }
 0x433   : > { %v1058_v11 = vpop.xlane.xlu1 %1057 }
 0x434   : > { %v1066_v12 = vsub.f32 %v951_v51, %v1058_v11 }
 0x436   : > { %v1070_v13 = vpack.c.bf16 %v1066_v12, %v1066_v12 }
 0x437   : > { %v1061_v14 = vpop.xlane.xlu0 %1060  ;;  %v743_v15 = vpop.permute.xlu1 %742 }
 0x438   : > { %v1077_v16 = vmul.bf16 1069105081, %v1070_v13  ;;  %v1067_v17 = vsub.f32 %v997_v57, %v1061_v14  ;;  %746 = vst.msk [vmem:[#allocation5 + $0x10] sm:$0xff] %vm720_vm2, %v743_v15  ;;  %v1733_v15 = vld [vmem:[#allocation20] ss:$0 sm:$0xff] }
 0x43a   : > { %2031 = vpow.bf16 %v1077_v16  ;;  %v1071_v18 = vpack.c.bf16 %v1067_v17, %v1067_v17 }
 0x43b   : > { %v753_v19 = vpop.permute.xlu1 %752  ;;  %v1064_v20 = vpop.xlane.xlu0 %1063 }
 0x43c   : > { %v1080_v21 = vmul.bf16 1069105081, %v1071_v18  ;;  %756 = vst.msk [vmem:[#allocation5 + $0x18] sm:$0xff] %vm720_vm2, %v753_v19  ;;  %v1068_v22 = vsub.f32 %v1043_v63, %v1064_v20 }
 0x43e   : > { %2033 = vpow.bf16 %v1080_v21  ;;  %v1072_v23 = vpack.c.bf16 %v1068_v22, %v1068_v22 }
 0x43f   : > { %v733_v24 = vpop.permute.xlu0 %732  ;;  %v855_v25 = vld [vmem:[#allocation5 + $0x10] sm:$0xff] }
 0x440   : > { %v1083_v26 = vmul.bf16 1069105081, %v1072_v23  ;;  %736 = vst.msk [vmem:[#allocation5 + $0x8] sm:$0xff] %vm720_vm2, %v733_v24  ;;  %1830 = vmatpush3.bf16.msra.mxu0 %v855_v25 }
 0x441   : > { %1841 = vmatprep.subr.bf16.mxu0 %v2510_v0 }
 0x442   : > { %2035 = vpow.bf16 %v1083_v26 }
 0x443   : > { %v856_v33 = vld [vmem:[#allocation5 + $0x18] sm:$0xff] }
 0x445   : > { %v2032_v27 = vpop.eup %2031 }
 0x446   : > { %v1086_v28 = vunpack.c.l.bf16 %v2032_v27 }
 0x447   : > { %v854_v29 = vld [vmem:[#allocation5 + $0x8] sm:$0xff] }
 0x448   : > { %1824 = vmatpush3.bf16.msra.mxu1 %v854_v29  ;;  %v1092_v30 = vsel %vm1048_vm4, %v1086_v28, 0.0 }
 0x449   : > { %v2034_v31 = vpop.eup %2033  ;;  %1093 = vadd.xlane.f32.xlu0 %v1092_v30  ;;  %1835 = vmatprep.subr.bf16.mxu1 %v2510_v0 }
 0x44a   : > { %1832 = vmatmul.mubr.msk.bf16.vlgmr.msra.gmra.mrb[16].mxu0 %vm1048_vm4, %v2034_v31  ;;  %v1087_v32 = vunpack.c.l.bf16 %v2034_v31 }
 0x44b   : > { %1826 = vmatmul.mubr.msk.bf16.vlgmr.msra.gmra.mrb[12].mxu1 %vm1048_vm4, %v2032_v27  ;;  %1845 = vmatprep.mubr.msk.bf16.mxu0 %vm2511_vm0, %v2510_v0 }
 0x44c   : > { %1836 = vmatpush3.bf16.msra.mxu1 %v856_v33  ;;  %v1095_v34 = vsel %vm1048_vm4, %v1087_v32, 0.0  ;;  %1837 = vmatprep.mubr.msk.bf16.mxu1 %vm2511_vm0, %v2510_v0 }
 0x44d   : > { %v2036_v35 = vpop.eup %2035  ;;  %1096 = vadd.xlane.f32.xlu1 %v1095_v34  ;;  %1842 = vmatpush3.bf16.msra.mxu0 %v2027_v53 }
 0x44e   : > { %v1088_v36 = vunpack.c.l.bf16 %v2036_v35  ;;  %1843 = vmatprep.subr.bf16.mxu0 %v2510_v0 }
 0x450   : > { %v1098_v37 = vsel %vm1048_vm4, %v1088_v36, 0.0 }
 0x451   : > { %1099 = vadd.xlane.f32.xlu0 %v1098_v37  ;;  %1844 = vmatpush3.bf16.msra.mxu0 %v2028_v61 }
 0x453   : > { %1838 = vmatmul.mubr.msk.bf16.vlgmr.msra.gmra.mrb[16].mxu1 %vm1048_vm4, %v2036_v35 }
 0x455   : > { %1090 = vadd.xlane.f32.xlu0 %v1089_v39 }
 0x4a6   : > { %v1138_v40 = vpop.f32.mrb[12].mxu0 }
 0x4a7   : > { %v1821_v41 = vpop.f32.mrb[13].mxu0 }
 0x4a8   : > { %v1141_v42 = vpop.f32.mrb[14].mxu0 }
 0x4a9   : > { %v1822_v43 = vpop.f32.mrb[15].mxu0 }
 0x4d6   : > { %v1094_v44 = vpop.xlane.xlu0 %1093 }
 0x4da   : > { %v1097_v50 = vpop.xlane.xlu1 %1096 }
 0x4de   : > { %v1100_v45 = vpop.xlane.xlu0 %1099 }
 0x4e2   : > { %v1091_v46 = vpop.xlane.xlu0 %1090 }
 0x4e3   : > { %2037 = vrcp.f32 %v1091_v46 }
 0x4e4   : > { %2039 = vrcp.f32 %v1097_v50 }
 0x4e5   : > { %2041 = vrcp.f32 %v1094_v44 }
 0x4e6   : > { %2043 = vrcp.f32 %v1100_v45 }
 0x4ed   : > { %v2038_v47 = vpop.eup %2037 }
 0x4ee   : > { %v1281_v48 = vmul.f32 %v2038_v47, %v1138_v40  ;;  %v2040_v51 = vpop.eup %2039 }
 0x4ef   : > { %v2042_v54 = vpop.eup %2041 }
 0x4f0   : > { %v1285_v49 = vpack.c.bf16 %v1281_v48, %v1281_v48  ;;  %v2044_v4 = vpop.eup %2043 }
 0x4f2   : > { %1286 = vst.msk [vmem:[#allocation3] sm:$0xf] %vm825_vm3, %v1285_v49 }
 0x51d   : > { %v1224_v52 = vpop.f32.mrb[16].mxu0 }
 0x51e   : > { %v1283_v55 = vmul.f32 %v2040_v51, %v1224_v52  ;;  %v1181_v56 = vpop.f32.mrb[12].mxu1  ;;  %v1833_v57 = vpop.f32.mrb[17].mxu0 }
 0x51f   : > { %v1282_v58 = vmul.f32 %v2042_v54, %v1181_v56  ;;  %v1827_v59 = vpop.f32.mrb[13].mxu1  ;;  %v1227_v60 = vpop.f32.mrb[18].mxu0 }
 0x520   : > { %v1749_v62 = vpack.c.bf16 %v1283_v55, %v1283_v55  ;;  %v1184_v63 = vpop.f32.mrb[14].mxu1  ;;  %v1834_v1 = vpop.f32.mrb[19].mxu0 }
 0x521   : > { %v1748_v2 = vpack.c.bf16 %v1282_v58, %v1282_v58  ;;  %v1828_v3 = vpop.f32.mrb[15].mxu1 }
 0x522   : > { %1300 = vrot.lane.b32.xlu0 %v1749_v62, %s2519_s7 }
 0x523   : > { %1291 = vrot.lane.b32.xlu1 %v1748_v2, %s2520_s12 }
 0x526   : > { %v1267_v5 = vpop.f32.mrb[16].mxu1 }
 0x527   : > { %v1284_v7 = vmul.f32 %v2044_v4, %v1267_v5  ;;  %v1839_v8 = vpop.f32.mrb[17].mxu1 }
 0x528   : > { %v1270_v9 = vpop.f32.mrb[18].mxu1 }
 0x529   : > { %v1750_v10 = vpack.c.bf16 %v1284_v7, %v1284_v7  ;;  %v1840_v11 = vpop.f32.mrb[19].mxu1 }
 0x52b   : > { %1309 = vrot.lane.b32.xlu1 %v1750_v10, %s2521_s1 }
 0x594   : > { %v1301_v12 = vpop.permute.xlu0 %1300 }
 0x595   : > { %v1292_v0 = vpop.permute.xlu1 %1291 }
 0x596   : > { %1295 = vst.msk [vmem:[#allocation3] sm:$0xf] %vm1294_vm5, %v1292_v0 }
 0x597   : > { %1304 = vst.msk [vmem:[#allocation3] sm:$0xf] %vm1303_vm6, %v1301_v12 }
 0x59d   : > { %v1310_v13 = vpop.permute.xlu1 %1309 }
 0x59e   : > { %1313 = vst.msk [vmem:[#allocation3] sm:$0xf] %vm1312_vm7, %v1310_v13 }
 0x5a5   : > { %v1314_v14 = vld [vmem:[#allocation3] sm:$0xf] }
 0x5a6   : > { %1846 = vmatmul.mubr.msk.bf16.vlgmr.msra.gmra.mrb[20].mxu0 %vm674_vm1, %v1314_v14 }
 0x679   : > { %v1375_v16 = vpop.f32.mrb[20].mxu0 }
 0x67a   : > { %v1376_v17 = vadd.f32 %v1733_v15, %v1375_v16  ;;  %v1847_v18 = vpop.f32.mrb[21].mxu0 }
 0x67b   : > { %v1378_v19 = vpop.f32.mrb[22].mxu0 }
 0x67c   : > { %v1848_v20 = vpop.f32.mrb[23].mxu0  ;;  %v1381_v21 = vadd.f32 %v1376_v17, %v3013_v6 }
 0x67e   : > { %v1382_v22 = vsel %vm674_vm1, %v1381_v21, 0.0 }
 0x67f   : > { %1383 = vadd.xlane.f32.xlu1 %v1382_v22 }
 0x70c   : > { %v1384_v23 = vpop.xlane.xlu1 %1383 }
 0x70d   : > { %v1386_v24 = vmul.f32 0.03125, %v1384_v23 }
 0x70f   : > { %v1387_v25 = vsub.f32 %v1381_v21, %v1386_v24 }
 0x711   : > { %v1388_v26 = vmul.f32 %v1387_v25, %v1387_v25 }
 0x713   : > { %v1389_v27 = vsel %vm674_vm1, %v1388_v26, 0.0 }
 0x714   : > { %1390 = vadd.xlane.f32.xlu0 %v1389_v27 }
 0x715   : > { %2374 = shalt.err (!%p2371_p3)
}
 0x716   : > { %s2375_s2 = scalar_lea.hbm %s3115_s27, 512  ;;  %s2379_s7 = scalar_lea.hbm %s3292_s29, 1024 }
 0x717   : > { %p2376_p13 = scmp.ne.s32.totalorder %s3115_s27, %s2375_s2  ;;  %p2380_p8 = scmp.lt.u32.totalorder %s3115_s27, %s3292_s29 }
 0x718   : > { %p2381_p12 = scmp.lt.u32.totalorder %s2379_s7, %s2375_s2  ;;  %p2383_p10 = scmp.lt.u32.totalorder %s2375_s2, %s3115_s27 }
 0x719   : > { %p2377_p2 = pnand %p2376_p13, %p3293_p11 }
 0x71a   : > { %p2382_p9 = por %p2381_p12, %p2380_p8 }
 0x71b   : > { %p2378_p4 = pneg %p2377_p2 }
 0x71c   : > { %p2384_p1 = por %p2383_p10, %p2382_p9 }
 0x71e   : > { %p2385_p5 = pnand %p2384_p1, %p2378_p4 }
 0x720   : > { %2388 = shalt.err (!%p2385_p5)
}
 0x721   : > { %s2523_s24 = smov 128   ;;  %v1737_v31 = vld [vmem:[#allocation21] ss:$0 sm:$0xff]  ;;  %v1738_v33 = vld [vmem:[#allocation23] ss:$0 sm:$0xff]  ;;  %s1741_s14 = sshll.u32 %s3290_s0, 7 }
 0x722   : > { %1888 = dma.vmem_to_hbm [thread:$0]  (%p3293_p11), %s3109_s13, 512, %s3115_s27, %s1419_s16, %s2523_s24, %s2523_s24, %s2520_s12  }
 0x723   : > { %s628_s26 = scalar_lea.vmem [#allocation24], %s2972_s30  ;;  %s3294_s17 = sld [smem:[#allocation49_spill]] }
 0x724   : > { %s1433_s23 = sshll.u32 %s628_s26, 4  ;;  %s1414_s12 = scalar_lea.sflag [#allocation8], %s2969_s9  ;;  %s3149_s23 = int_to_ptr.vmem [resolvable:$true] %s1433_s23 }
 0x725   : > { %s2389_s13 = scalar_lea.vmem %s3149_s23, 128  ;;  %s2524_s30 = smov [#allocation24]  }
 0x726   : > { %p2390_p0 = scmp.ne.s32.totalorder %s3149_s23, %s2389_s13  ;;  %s2393_s0 = sshll.u32 %s2524_s30, 4  ;;  %s2394_s0 = int_to_ptr.vmem [resolvable:$false] %s2393_s0 }
 0x727   : > { %s2395_s27 = scalar_lea.vmem %s2394_s0, 256  ;;  %p2396_p3 = scmp.lt.s32.totalorder %s3149_s23, %s2394_s0 }
 0x728   : > { %p2391_p6 = pnand %p2390_p0, %p3293_p11  ;;  %p2397_p13 = scmp.lt.s32.totalorder %s2395_s27, %s2389_s13 }
 0x729   : > { %s3147_s2 = scalar_lea.hbm %s3294_s17, %s1741_s14 }
 0x72a   : > { %p2392_p7 = pneg %p2391_p6  ;;  %p2398_p2 = por %p2397_p13, %p2396_p3 }
 0x72c   : > { %p2399_p4 = pnand %p2398_p2, %p2392_p7 }
 0x7a1   : > { %v1391_v6 = vpop.xlane.xlu0 %1390 }
 0x7a2   : > { %v1392_v28 = vmul.f32 0.03125, %v1391_v6 }
 0x7a4   : > { %v1393_v29 = vadd.f32 1e-12, %v1392_v28 }
 0x7a6   : > { %2045 = vrsqrt.f32 %v1393_v29 }
 0x7b0   : > { %v2046_v30 = vpop.eup %2045 }
 0x7b1   : > { %v1395_v32 = vmul.f32 %v2046_v30, %v1387_v25 }
 0x7b3   : > { %v1403_v34 = vmul.f32 %v1737_v31, %v1395_v32 }
 0x7b5   : > { %v1411_v35 = vadd.f32 %v1738_v33, %v1403_v34 }
 0x7b7   : > { %1412 = vst.msk [vmem:[%s628_s26] sm:$0xff] %vm674_vm1, %v1411_v35 }
 0x7b8   : > { %2402 = shalt.err (!%p2399_p4)
}
 0x7b9   : > { %s2403_s9 = scalar_lea.hbm %s3147_s2, 128  ;;  %s2407_s15 = scalar_lea.hbm %s3294_s17, 256 }
 0x7ba   : > { %p2404_p8 = scmp.ne.s32.totalorder %s3147_s2, %s2403_s9  ;;  %p2408_p10 = scmp.lt.u32.totalorder %s3147_s2, %s3294_s17 }
 0x7bb   : > { %p2409_p1 = scmp.lt.u32.totalorder %s2407_s15, %s2403_s9  ;;  %p2411_p0 = scmp.lt.u32.totalorder %s2403_s9, %s3147_s2 }
 0x7bc   : > { %p2405_p12 = pnand %p2404_p8, %p3293_p11 }
 0x7bd   : > { %p2410_p5 = por %p2409_p1, %p2408_p10 }
 0x7be   : > { %p2406_p9 = pneg %p2405_p12 }
 0x7bf   : > { %p2412_p6 = por %p2411_p0, %p2410_p5 }
 0x7c1   : > { %p2413_p7 = pnand %p2412_p6, %p2406_p9 }
 0x7c3   : > { %2416 = shalt.err (!%p2413_p7)
}
 0x7c4   : > { %1887 = dma.vmem_to_hbm [thread:$0]  (%p3293_p11), %s3149_s23, 128, %s3147_s2, %s1414_s12  }
 0x7c5 PF: > { %s3295_s18 = sld [smem:[#allocation41_spill]]  ;;  %s3296_s24 = sld [smem:[#allocation37_spill]] }
 0x7c6   : > { %s1462_s14 = sand.u32 1, %s2475_s21  }
 0x7c7   : > { %s1463_s26 = scalar_lea.sflag [#allocation8], %s1462_s14 }
 0x7cb   : > { %p3297_p3 = scmp.ne.s32.totalorder %s3295_s18, 0  ;;  %p3298_p13 = scmp.ge.s32.totalorder %s3296_s24, 2 }
 0x7cd   : > { %p1927_p2 = pnand %p3298_p13, %p3297_p3 }
 0x7cf   : > { %2466 = dma.done.wait (!%p1927_p2), %s1463_s26, 128  }
 0x7d0   : > { %2468 = vsyncadd (!%p1927_p2), %s1463_s26, 4294967168  ;;  %s1472_s28 = scalar_lea.sflag [#allocation26], %s1462_s14 }
 0x7d1   : > { %2470 = dma.done.wait (!%p1927_p2), %s1472_s28, 512  }
 0x7d2   : > { %2472 = vsyncadd (!%p1927_p2), %s1472_s28, 4294966784  ;;  %s39_s26 = sadd.s32 1, %s3296_s24   ;;  %s3299_s11 = sld [smem:[#allocation35_spill]] }
 0x7d3   : > { %p36_p4 = scmp.ge.s32.totalorder %s39_s26, 4   ;;  %s3300_s23 = sld [smem:[#allocation40_spill]] }
 0x7d4   : > { %s3301_s19 = sld [smem:[#allocation39_spill]]  ;;  %s3302_s21 = smov %s2479_s22 }
 0x7d5   : > { %s3304_s24 = smov %s2491_s25  ;;  %38 = sbr.rel (!%p36_p4) target bundleno = 24 (0x18), region = 195 }
 0x7d8   : > { %s3303_s22 = smov %s3299_s11 }
 0x7da   : > { %s3305_s25 = smov %s3301_s19 }
 0x7dc   :  { %1477 = vsyncpa [#allocation7], 1 }
 0x7dd   :  { %1479 = vsyncpa [#allocation7 + $0x1], 1 }
 0x7de   :  { %1480 = vsyncpa [#allocation10], 1 }
 0x7df   :  { %1482 = vsyncpa [#allocation10 + $0x1], 1 }
 0x7e0   :  { %1483 = vsyncpa [#allocation13], 1 }
 0x7e1   :  { %1484 = vsyncpa [#allocation16], 1 }
 0x7e2   :  { %1485 = vsyncpa [#allocation19], 1 }
 0x7e3   :  { %1486 = vsyncpa [#allocation22], 1 }
 0x7e4   :  { %1487 = vsyncpa [#allocation8], 1 }
 0x7e5   :  { %1489 = vsyncpa [#allocation8 + $0x1], 1 }
 0x7e6   :  { %1490 = vsyncpa [#allocation26], 1 }
 0x7e7   :  { %1492 = vsyncpa [#allocation26 + $0x1], 1 }

</bundles_post_ra>
